<compile_context>
chip_gen: v5e
topology: v5e:2x2
jax: 0.10.0
libtpu: 0.0.40
codegen_flags: <defaults>
</compile_context>

<pallas_src>
import functools

import jax
import jax.numpy as jnp
from jax.experimental import pallas as pl
from jax.experimental.pallas import tpu as pltpu


def _round_up(n, m):
    return ((n + m - 1) // m) * m


def _cdiv(a, b):
    return (a + b - 1) // b


def _num_tensorcores_per_chip():
    """Best-effort TensorCore-per-chip count (1 on v5e/v6e, 2 on v4/v7x)."""
    try:
        kind = jax.devices()[0].device_kind.lower()
    except Exception:
        return 1
    return 2 if any(tag in kind for tag in ("v7", "7x", "v4")) else 1


def choose_block_b(batch_size, num_batch_blocks=None, max_block_b=1024):
    """Batch tile: whole batch on single-TC chips, one block per TC otherwise."""
    if num_batch_blocks is None:
        num_batch_blocks = _num_tensorcores_per_chip()
    n_blocks = max(num_batch_blocks, _cdiv(batch_size, max_block_b))
    return max(8, _round_up(_cdiv(batch_size, n_blocks), 8))


def prepare_params(w1, b1, w2, b2):
    """One-time parameter prep (call once at setup, NOT per forward).

    w1: [H, F], b1: [H], w2: [C, H], b2: [C]  (PyTorch nn.Linear layout).
    Transposes to [in, out], pads H/C to lane-dense multiples of 128, casts
    weights to bf16 (native MXU dtype) and biases to padded f32 rows.
    """
    H, F = w1.shape
    C = w2.shape[0]
    Hp = _round_up(H, 128)
    Cp = _round_up(C, 128)
    w1_p = jnp.pad(w1.T, ((0, 0), (0, Hp - H))).astype(jnp.bfloat16)   # [F, Hp]
    b1_p = jnp.pad(jnp.reshape(b1, (1, H)).astype(jnp.float32),
                   ((0, 0), (0, Hp - H)))                              # [1, Hp]
    w2_p = jnp.pad(w2.T, ((0, Hp - H), (0, Cp - C))).astype(jnp.bfloat16)  # [Hp, Cp]
    b2_p = jnp.pad(jnp.reshape(b2, (1, C)).astype(jnp.float32),
                   ((0, 0), (0, Cp - C)))                              # [1, Cp]
    return w1_p, b1_p, w2_p, b2_p


def _mlp_kernel(x_ref, w1_ref, b1_ref, w2_ref, b2_ref, o_ref):
    # Cast x to bf16 in-kernel (VPU cast hides under the MXU matmul); avoids a
    # separate wrapper-side pad+cast pass over x in HBM.
    x = x_ref[...].astype(jnp.bfloat16)
    # Hidden layer: x @ W1 on the MXU with f32 accumulation.
    h = jnp.dot(x, w1_ref[...], preferred_element_type=jnp.float32)
    # Bias add + sigmoid in f32 (VPU/EUP); b1 is (1, Hp) and broadcasts.
    h = jax.nn.sigmoid(h + b1_ref[...])
    # Output layer: h @ W2 (activations back to bf16 for the MXU).
    logits = jnp.dot(h.astype(jnp.bfloat16), w2_ref[...],
                     preferred_element_type=jnp.float32)
    o_ref[...] = (logits + b2_ref[...]).astype(o_ref.dtype)


@functools.partial(jax.jit, static_argnames=("block_b", "num_classes"))
def mlp_forward(x, w1_p, b1_p, w2_p, b2_p, *, block_b, num_classes):
    """x: [B, F] float; params from prepare_params(). Returns f32 [B, num_classes]."""
    B, F = x.shape
    Hp = w1_p.shape[1]
    Cp = w2_p.shape[1]

    Bp = _round_up(B, block_b)
    if Bp != B:  # static branch; pad only when the batch doesn't divide the tile
        x = jnp.pad(x, ((0, Bp - B), (0, 0)))

    grid = (Bp // block_b,)

    # Explicit VMEM budget: double-buffered x/out tiles + resident bf16 weights
    # + f32 intermediates, with 2x headroom, clamped to stay valid on v5e's
    # 16 MiB default scoped limit and under v7x's 64 MiB physical VMEM.
    # TODO(synk): add a K-reduction grid axis with a VMEM f32 accumulator when
    # the resident weight bytes (F*Hp + Hp*Cp in bf16) approach this budget.
    est = (2 * block_b * F * x.dtype.itemsize      # x tiles (input dtype)
           + 2 * (F * Hp + Hp * Cp) * 2            # bf16 weights (worst case x2)
           + 2 * (Hp + Cp) * 4                     # biases
           + 2 * block_b * Cp * 4                  # f32 output tiles
           + block_b * (Hp + Cp) * 4)              # f32 intermediates
    vmem_limit = int(min(max(2 * est, 8 << 20), 48 << 20))

    out = pl.pallas_call(
        _mlp_kernel,
        out_shape=jax.ShapeDtypeStruct((Bp, Cp), jnp.float32),
        grid_spec=pltpu.PrefetchScalarGridSpec(
            num_scalar_prefetch=0,
            grid=grid,
            in_specs=[
                pl.BlockSpec((block_b, F), lambda i: (i, 0)),   # x tile (streamed)
                pl.BlockSpec((F, Hp), lambda i: (0, 0)),        # W1^T (VMEM-resident)
                pl.BlockSpec((1, Hp), lambda i: (0, 0)),        # b1
                pl.BlockSpec((Hp, Cp), lambda i: (0, 0)),       # W2^T (VMEM-resident)
                pl.BlockSpec((1, Cp), lambda i: (0, 0)),        # b2
            ],
            out_specs=pl.BlockSpec((block_b, Cp), lambda i: (i, 0)),
        ),
        compiler_params=pltpu.CompilerParams(
            dimension_semantics=("parallel",),
            vmem_limit_bytes=vmem_limit),
    )(x, w1_p, b1_p, w2_p, b2_p)

    return out[:B, :num_classes]


def mlp_reference(x, w1, b1, w2, b2):
    # Pure-JAX reference in PyTorch layout, mirroring the kernel's bf16
    # rounding of the matmul inputs (f32 accumulation otherwise).
    xb = x.astype(jnp.bfloat16).astype(jnp.float32)
    w1b = w1.astype(jnp.bfloat16).astype(jnp.float32)
    w2b = w2.astype(jnp.bfloat16).astype(jnp.float32)
    h = jax.nn.sigmoid(xb @ w1b.T + jnp.reshape(b1, (1, -1)))
    hb = h.astype(jnp.bfloat16).astype(jnp.float32)
    return hb @ w2b.T + jnp.reshape(b2, (1, -1))


if __name__ == "__main__":
    # FashionMNIST-like shapes implied by the module: 28*28 flattened features,
    # 10 classes, modest hidden width.
    batch = 256
    num_features = 784
    num_hidden = 128
    num_classes = 10

    key = jax.random.PRNGKey(0)
    kx, kw1, kw2 = jax.random.split(key, 3)

    # Deterministic parameter init mirroring the PyTorch module:
    #   weights ~ Normal(0, 0.1), biases = 0.
    x = jax.random.normal(kx, (batch, num_features), dtype=jnp.float32)
    w1 = 0.1 * jax.random.normal(kw1, (num_hidden, num_features), jnp.float32)
    b1 = jnp.zeros((num_hidden,), jnp.float32)
    w2 = 0.1 * jax.random.normal(kw2, (num_classes, num_hidden), jnp.float32)
    b2 = jnp.zeros((num_classes,), jnp.float32)

    # One-time parameter prep (pad + bf16 cast), hoisted out of the forward path.
    params = prepare_params(w1, b1, w2, b2)
    # Whole batch in one grid step on single-TC chips; split across TCs on v7x/v4.
    block_b = choose_block_b(batch)

    logits = mlp_forward(x, *params, block_b=block_b, num_classes=num_classes)
    jax.block_until_ready(logits)

    ref = mlp_reference(x, w1, b1, w2, b2)
    assert logits.shape == (batch, num_classes)
    assert jnp.allclose(logits, ref, atol=1e-2, rtol=1e-2), (
        float(jnp.max(jnp.abs(logits - ref))))

    print("KERNEL_OK")
</pallas_src>

<mosaic_0001>
module attributes {stable_mosaic.version = 11 : i64} {
  func.func @_mlp_kernel(%arg0: i32, %arg1: memref<256x784xf32, #tpu.memory_space<vmem>>, %arg2: memref<784x128xbf16, #tpu.memory_space<vmem>>, %arg3: memref<1x128xf32, #tpu.memory_space<vmem>>, %arg4: memref<128x128xbf16, #tpu.memory_space<vmem>>, %arg5: memref<1x128xf32, #tpu.memory_space<vmem>>, %arg6: memref<256x128xf32, #tpu.memory_space<vmem>>) attributes {dimension_semantics = [#tpu.dimension_semantics<parallel>], iteration_bounds = array<i64: 1>, scalar_prefetch = 0 : i64, scratch_operands = 0 : i64, tpu.core_type = #tpu.core_type<tc>, window_params = [{transform_indices = @transform_0, window_bounds = array<i64: 256, 784>}, {pipeline_mode = #tpu.pipeline_mode<synchronous>, transform_indices = @transform_1, window_bounds = array<i64: 784, 128>}, {pipeline_mode = #tpu.pipeline_mode<synchronous>, transform_indices = @transform_2, window_bounds = array<i64: 1, 128>}, {pipeline_mode = #tpu.pipeline_mode<synchronous>, transform_indices = @transform_3, window_bounds = array<i64: 128, 128>}, {pipeline_mode = #tpu.pipeline_mode<synchronous>, transform_indices = @transform_4, window_bounds = array<i64: 1, 128>}, {transform_indices = @transform_5, window_bounds = array<i64: 256, 128>}]} {
    %c0 = arith.constant 0 : index
    %c0_0 = arith.constant 0 : index
    %0 = vector.load %arg1[%c0, %c0_0] : memref<256x784xf32, #tpu.memory_space<vmem>>, vector<256x784xf32>
    %1 = arith.truncf %0 : vector<256x784xf32> to vector<256x784xbf16>
    %c0_1 = arith.constant 0 : index
    %c0_2 = arith.constant 0 : index
    %2 = vector.load %arg2[%c0_1, %c0_2] : memref<784x128xbf16, #tpu.memory_space<vmem>>, vector<784x128xbf16>
    %cst = arith.constant dense<0.000000e+00> : vector<256x128xf32>
    %3 = tpu.matmul %1, %2, %cst {dimension_numbers = #tpu.dot_dimension_numbers<[1], [0], [0], [1], [0, 0, 1, 1], [], []>} : vector<256x784xbf16>, vector<784x128xbf16>, vector<256x128xf32> -> vector<256x128xf32>
    %c0_3 = arith.constant 0 : index
    %c0_4 = arith.constant 0 : index
    %4 = vector.load %arg3[%c0_3, %c0_4] : memref<1x128xf32, #tpu.memory_space<vmem>>, vector<1x128xf32>
    %5 = vector.broadcast %4 : vector<1x128xf32> to vector<256x128xf32>
    %6 = arith.addf %3, %5 : vector<256x128xf32>
    %7 = arith.negf %6 : vector<256x128xf32>
    %8 = math.exp %7 : vector<256x128xf32>
    %cst_5 = arith.constant 1.000000e+00 : f32
    %9 = vector.broadcast %cst_5 : f32 to vector<256x128xf32>
    %10 = arith.addf %9, %8 : vector<256x128xf32>
    %11 = arith.divf %9, %10 : vector<256x128xf32>
    %12 = arith.truncf %11 : vector<256x128xf32> to vector<256x128xbf16>
    %c0_6 = arith.constant 0 : index
    %c0_7 = arith.constant 0 : index
    %13 = vector.load %arg4[%c0_6, %c0_7] : memref<128x128xbf16, #tpu.memory_space<vmem>>, vector<128x128xbf16>
    %cst_8 = arith.constant dense<0.000000e+00> : vector<256x128xf32>
    %14 = tpu.matmul %12, %13, %cst_8 {dimension_numbers = #tpu.dot_dimension_numbers<[1], [0], [0], [1], [0, 0, 1, 1], [], []>} : vector<256x128xbf16>, vector<128x128xbf16>, vector<256x128xf32> -> vector<256x128xf32>
    %c0_9 = arith.constant 0 : index
    %c0_10 = arith.constant 0 : index
    %15 = vector.load %arg5[%c0_9, %c0_10] : memref<1x128xf32, #tpu.memory_space<vmem>>, vector<1x128xf32>
    %16 = vector.broadcast %15 : vector<1x128xf32> to vector<256x128xf32>
    %17 = arith.addf %14, %16 : vector<256x128xf32>
    %c0_11 = arith.constant 0 : index
    %c0_12 = arith.constant 0 : index
    %18 = vector.load %arg6[%c0_11, %c0_12] : memref<256x128xf32, #tpu.memory_space<vmem>>, vector<256x128xf32>
    tpu.vector_store %arg6[%c0_11, %c0_12], %17 {strides = array<i32>} : memref<256x128xf32, #tpu.memory_space<vmem>>, vector<256x128xf32>,
    return
  }
  func.func @transform_0(%arg0: i32) -> (i32, i32) {
    %c0_i32 = arith.constant 0 : i32
    %c0_i32_0 = arith.constant 0 : i32
    return %arg0, %c0_i32 : i32, i32
  }
  func.func @transform_1(%arg0: i32) -> (i32, i32) {
    %c0_i32 = arith.constant 0 : i32
    %c0_i32_0 = arith.constant 0 : i32
    %c0_i32_1 = arith.constant 0 : i32
    return %c0_i32, %c0_i32_0 : i32, i32
  }
  func.func @transform_2(%arg0: i32) -> (i32, i32) {
    %c0_i32 = arith.constant 0 : i32
    %c0_i32_0 = arith.constant 0 : i32
    %c0_i32_1 = arith.constant 0 : i32
    return %c0_i32, %c0_i32_0 : i32, i32
  }
  func.func @transform_3(%arg0: i32) -> (i32, i32) {
    %c0_i32 = arith.constant 0 : i32
    %c0_i32_0 = arith.constant 0 : i32
    %c0_i32_1 = arith.constant 0 : i32
    return %c0_i32, %c0_i32_0 : i32, i32
  }
  func.func @transform_4(%arg0: i32) -> (i32, i32) {
    %c0_i32 = arith.constant 0 : i32
    %c0_i32_0 = arith.constant 0 : i32
    %c0_i32_1 = arith.constant 0 : i32
    return %c0_i32, %c0_i32_0 : i32, i32
  }
  func.func @transform_5(%arg0: i32) -> (i32, i32) {
    %c0_i32 = arith.constant 0 : i32
    %c0_i32_0 = arith.constant 0 : i32
    return %arg0, %c0_i32 : i32, i32
  }
}

</mosaic_0001>

<bundles_post_ra>
// kernel: mlp_forward.1
= control target key start
LH: loop header
LB: loop body
LE: loop exit
PB: predicated region body
PF: predicated region fallthrough
CT: control target
= control target key end

     0   :  { %vm753_vm0 = vcmask 130048   ;;  %s4310_s1 = inlined_call_operand.vmem [shape: bf16[784,128], index: 1, kind: input, shape index: {}]   ;;  %s4311_s2 = inlined_call_operand.vmem [shape: f32[1,128], index: 2, kind: input, shape index: {}]   ;;  %s4312_s0 = inlined_call_operand.vmem [shape: f32[256,784], index: 0, kind: input, shape index: {}]   ;;  %s4313_s3 = inlined_call_operand.vmem [shape: bf16[128,128], index: 3, kind: input, shape index: {}]   ;;  %s4314_s4 = inlined_call_operand.vmem [shape: f32[1,128], index: 4, kind: input, shape index: {}]   ;;  %s4315_s5 = inlined_call_operand.vmem [shape: f32[256,128], index: 5, kind: output, shape index: {}]  }
   0x1   :  { %v2525_v0 = vld [vmem:[%s4310_s1 + $0x38] sm:$0xff]  ;;  %v2524_v4 = vld [vmem:[%s4310_s1 + $0x30] sm:$0xff]  ;;  %v2523_v8 = vld [vmem:[%s4310_s1 + $0x28] sm:$0xff] }
   0x2   :  { %v2533_v1 = vld [vmem:[%s4310_s1 + $0x78] sm:$0xff]  ;;  %802 = vmatpush.bf16.msra.mxu0 %v2525_v0  ;;  %v2532_v5 = vld [vmem:[%s4310_s1 + $0x70] sm:$0xff]  ;;  %v2531_v9 = vld [vmem:[%s4310_s1 + $0x68] sm:$0xff] }
   0x3   :  { %v2541_v2 = vld [vmem:[%s4310_s1 + $0xb8] sm:$0xff]  ;;  %891 = vmatpush.bf16.msra.mxu1 %v2533_v1  ;;  %v2540_v6 = vld [vmem:[%s4310_s1 + $0xb0] sm:$0xff]  ;;  %v2539_v10 = vld [vmem:[%s4310_s1 + $0xa8] sm:$0xff] }
   0x4   :  { %v2549_v3 = vld [vmem:[%s4310_s1 + $0xf8] sm:$0xff]  ;;  %980 = vmatpush.bf16.msra.mxu2 %v2541_v2  ;;  %v2548_v7 = vld [vmem:[%s4310_s1 + $0xf0] sm:$0xff]  ;;  %v2547_v11 = vld [vmem:[%s4310_s1 + $0xe8] sm:$0xff] }
   0x5   :  { %1069 = vmatpush.bf16.msra.mxu3 %v2549_v3  ;;  %v2522_v12 = vld [vmem:[%s4310_s1 + $0x20] sm:$0xff]  ;;  %v2521_v16 = vld [vmem:[%s4310_s1 + $0x18] sm:$0xff]  ;;  %v2520_v20 = vld [vmem:[%s4310_s1 + $0x10] sm:$0xff] }
   0x6   :  { %803 = vmatpush.bf16.msra.mxu0 %v2524_v4  ;;  %v2530_v13 = vld [vmem:[%s4310_s1 + $0x60] sm:$0xff]  ;;  %v2529_v17 = vld [vmem:[%s4310_s1 + $0x58] sm:$0xff]  ;;  %v2528_v21 = vld [vmem:[%s4310_s1 + $0x50] sm:$0xff] }
   0x7   :  { %892 = vmatpush.bf16.msra.mxu1 %v2532_v5  ;;  %v2538_v14 = vld [vmem:[%s4310_s1 + $0xa0] sm:$0xff]  ;;  %v2537_v18 = vld [vmem:[%s4310_s1 + $0x98] sm:$0xff]  ;;  %v2536_v22 = vld [vmem:[%s4310_s1 + $0x90] sm:$0xff] }
   0x8   :  { %981 = vmatpush.bf16.msra.mxu2 %v2540_v6  ;;  %v2546_v15 = vld [vmem:[%s4310_s1 + $0xe0] sm:$0xff]  ;;  %v2545_v19 = vld [vmem:[%s4310_s1 + $0xd8] sm:$0xff]  ;;  %v2544_v23 = vld [vmem:[%s4310_s1 + $0xd0] sm:$0xff] }
   0x9   :  { %1070 = vmatpush.bf16.msra.mxu3 %v2548_v7  ;;  %v2519_v24 = vld [vmem:[%s4310_s1 + $0x8] sm:$0xff]  ;;  %v2518_v28 = vld [vmem:[%s4310_s1] sm:$0xff]  ;;  %v28_v33 = vld [vmem:[%s4312_s0 + $0x38] sm:$0xff] }
   0xa   :  { %804 = vmatpush.bf16.msra.mxu0 %v2523_v8  ;;  %v2527_v25 = vld [vmem:[%s4310_s1 + $0x48] sm:$0xff]  ;;  %v2526_v29 = vld [vmem:[%s4310_s1 + $0x40] sm:$0xff]  ;;  %v23_v36 = vld [vmem:[%s4312_s0 + $0x10] sm:$0xff] }
   0xb   :  { %893 = vmatpush.bf16.msra.mxu1 %v2531_v9  ;;  %v2535_v26 = vld [vmem:[%s4310_s1 + $0x88] sm:$0xff]  ;;  %v2534_v30 = vld [vmem:[%s4310_s1 + $0x80] sm:$0xff]  ;;  %v24_v38 = vld [vmem:[%s4312_s0 + $0x18] sm:$0xff] }
   0xc   :  { %982 = vmatpush.bf16.msra.mxu2 %v2539_v10  ;;  %v2543_v27 = vld [vmem:[%s4310_s1 + $0xc8] sm:$0xff]  ;;  %v2542_v31 = vld [vmem:[%s4310_s1 + $0xc0] sm:$0xff]  ;;  %v31_v39 = vld [vmem:[%s4312_s0 + $0x50] sm:$0xff] }
   0xd   :  { %1071 = vmatpush.bf16.msra.mxu3 %v2547_v11  ;;  %v21_v32 = vld [vmem:[%s4312_s0] sm:$0xff]  ;;  %v22_v34 = vld [vmem:[%s4312_s0 + $0x8] sm:$0xff]  ;;  %v2557_v41 = vld [vmem:[%s4310_s1 + $0x138] sm:$0xff]  ;;  %v248_v45 = vpack.c.bf16 %v31_v39, %v24_v38 }
   0xe   :  { %805 = vmatpush.bf16.msra.mxu0 %v2522_v12  ;;  %v29_v35 = vld [vmem:[%s4312_s0 + $0x40] sm:$0xff]  ;;  %v30_v37 = vld [vmem:[%s4312_s0 + $0x48] sm:$0xff]  ;;  %v245_v42 = vpack.c.bf16 %v28_v33, %v21_v32  ;;  %v2565_v46 = vld [vmem:[%s4310_s1 + $0x178] sm:$0xff] }
   0xf   :  { %894 = vmatpush.bf16.msra.mxu1 %v2530_v13  ;;  %v2566_v40 = vld [vmem:[%s4310_s1 + $0x180] sm:$0xff]  ;;  %v246_v43 = vpack.c.bf16 %v29_v35, %v22_v34  ;;  %v247_v44 = vpack.c.bf16 %v30_v37, %v23_v36  ;;  %v2556_v47 = vld [vmem:[%s4310_s1 + $0x130] sm:$0xff]  ;;  %v42_v50 = vld [vmem:[%s4312_s0 + $0xa8] sm:$0xff] }
  0x10   :  { %983 = vmatpush.bf16.msra.mxu2 %v2538_v14  ;;  %v2564_v48 = vld [vmem:[%s4310_s1 + $0x170] sm:$0xff]  ;;  %v36_v51 = vld [vmem:[%s4312_s0 + $0x78] sm:$0xff]  ;;  %v37_v53 = vld [vmem:[%s4312_s0 + $0x80] sm:$0xff] }
  0x11   :  { %1072 = vmatpush.bf16.msra.mxu3 %v2546_v15  ;;  %v35_v49 = vld [vmem:[%s4312_s0 + $0x70] sm:$0xff]  ;;  %v44_v54 = vld [vmem:[%s4312_s0 + $0xb8] sm:$0xff]  ;;  %v38_v55 = vld [vmem:[%s4312_s0 + $0x88] sm:$0xff] }
  0x12   :  { %806 = vmatpush.bf16.msra.mxu0 %v2521_v16  ;;  %v43_v52 = vld [vmem:[%s4312_s0 + $0xb0] sm:$0xff]  ;;  %v45_v56 = vld [vmem:[%s4312_s0 + $0xc0] sm:$0xff]  ;;  %v252_v57 = vpack.c.bf16 %v42_v50, %v35_v49  ;;  %v254_v59 = vpack.c.bf16 %v44_v54, %v37_v53  ;;  %v56_v62 = vld [vmem:[%s4312_s0 + $0x118] sm:$0xff] }
  0x13   :  { %895 = vmatpush.bf16.msra.mxu1 %v2529_v17  ;;  %v253_v58 = vpack.c.bf16 %v43_v52, %v36_v51  ;;  %v255_v60 = vpack.c.bf16 %v45_v56, %v38_v55  ;;  %v49_v61 = vld [vmem:[%s4312_s0 + $0xe0] sm:$0xff]  ;;  %v50_v63 = vld [vmem:[%s4312_s0 + $0xe8] sm:$0xff]  ;;  %v51_v1 = vld [vmem:[%s4312_s0 + $0xf0] sm:$0xff] }
  0x14   :  { %984 = vmatpush.bf16.msra.mxu2 %v2537_v18  ;;  %v57_v0 = vld [vmem:[%s4312_s0 + $0x120] sm:$0xff]  ;;  %v58_v2 = vld [vmem:[%s4312_s0 + $0x128] sm:$0xff]  ;;  %v52_v3 = vld [vmem:[%s4312_s0 + $0xf8] sm:$0xff]  ;;  %v259_v5 = vpack.c.bf16 %v56_v62, %v49_v61 }
  0x15   :  { %1073 = vmatpush.bf16.msra.mxu3 %v2545_v19  ;;  %v59_v4 = vld [vmem:[%s4312_s0 + $0x130] sm:$0xff]  ;;  %v260_v6 = vpack.c.bf16 %v57_v0, %v50_v63  ;;  %v261_v7 = vpack.c.bf16 %v58_v2, %v51_v1  ;;  %v2555_v9 = vld [vmem:[%s4310_s1 + $0x128] sm:$0xff]  ;;  %v64_v13 = vld [vmem:[%s4312_s0 + $0x158] sm:$0xff] }
  0x16   :  { %807 = vmatpush.bf16.msra.mxu0 %v2520_v20  ;;  %v262_v8 = vpack.c.bf16 %v59_v4, %v52_v3  ;;  %v2563_v10 = vld [vmem:[%s4310_s1 + $0x168] sm:$0xff]  ;;  %v63_v11 = vld [vmem:[%s4312_s0 + $0x150] sm:$0xff]  ;;  %v65_v15 = vld [vmem:[%s4312_s0 + $0x160] sm:$0xff] }
  0x17   :  { %896 = vmatpush.bf16.msra.mxu1 %v2528_v21  ;;  %v70_v12 = vld [vmem:[%s4312_s0 + $0x188] sm:$0xff]  ;;  %v71_v14 = vld [vmem:[%s4312_s0 + $0x190] sm:$0xff]  ;;  %v72_v16 = vld [vmem:[%s4312_s0 + $0x198] sm:$0xff] }
  0x18   :  { %985 = vmatpush.bf16.msra.mxu2 %v2536_v22  ;;  %v66_v17 = vld [vmem:[%s4312_s0 + $0x168] sm:$0xff]  ;;  %v73_v18 = vld [vmem:[%s4312_s0 + $0x1a0] sm:$0xff]  ;;  %v266_v19 = vpack.c.bf16 %v70_v12, %v63_v11  ;;  %v267_v20 = vpack.c.bf16 %v71_v14, %v64_v13  ;;  %v268_v21 = vpack.c.bf16 %v72_v16, %v65_v15  ;;  %v91_v37 = vld [vmem:[%s4312_s0 + $0x230] sm:$0xff] }
  0x19   :  { %1074 = vmatpush.bf16.msra.mxu3 %v2544_v23  ;;  %v269_v22 = vpack.c.bf16 %v73_v18, %v66_v17  ;;  %v77_v23 = vld [vmem:[%s4312_s0 + $0x1c0] sm:$0xff]  ;;  %v98_v38 = vld [vmem:[%s4312_s0 + $0x268] sm:$0xff]  ;;  %v92_v39 = vld [vmem:[%s4312_s0 + $0x238] sm:$0xff] }
  0x1a   :  { %808 = vmatpush.bf16.msra.mxu0 %v2519_v24  ;;  %v84_v24 = vld [vmem:[%s4312_s0 + $0x1f8] sm:$0xff]  ;;  %v2554_v35 = vld [vmem:[%s4310_s1 + $0x120] sm:$0xff]  ;;  %v106_v51 = vld [vmem:[%s4312_s0 + $0x2a8] sm:$0xff] }
  0x1b   :  { %897 = vmatpush.bf16.msra.mxu1 %v2527_v25  ;;  %v78_v25 = vld [vmem:[%s4312_s0 + $0x1c8] sm:$0xff]  ;;  %v2562_v36 = vld [vmem:[%s4310_s1 + $0x160] sm:$0xff]  ;;  %v112_v50 = vld [vmem:[%s4312_s0 + $0x2d8] sm:$0xff] }
  0x1c   :  { %986 = vmatpush.bf16.msra.mxu2 %v2535_v26  ;;  %v85_v26 = vld [vmem:[%s4312_s0 + $0x200] sm:$0xff]  ;;  %v107_v53 = vld [vmem:[%s4312_s0 + $0x2b0] sm:$0xff]  ;;  %v114_v54 = vld [vmem:[%s4312_s0 + $0x2e8] sm:$0xff] }
  0x1d   :  { %1075 = vmatpush.bf16.msra.mxu3 %v2543_v27  ;;  %v79_v27 = vld [vmem:[%s4312_s0 + $0x1d0] sm:$0xff]  ;;  %v274_v32 = vpack.c.bf16 %v85_v26, %v78_v25  ;;  %v105_v49 = vld [vmem:[%s4312_s0 + $0x2a0] sm:$0xff]  ;;  %v108_v55 = vld [vmem:[%s4312_s0 + $0x2b8] sm:$0xff] }
  0x1e   :  { %809 = vmatpush.bf16.msra.mxu0 %v2518_v28  ;;  %v86_v28 = vld [vmem:[%s4312_s0 + $0x208] sm:$0xff]  ;;  %v113_v52 = vld [vmem:[%s4312_s0 + $0x2e0] sm:$0xff]  ;;  %v115_v56 = vld [vmem:[%s4312_s0 + $0x2f0] sm:$0xff] }
  0x1f   :  { %898 = vmatpush.bf16.msra.mxu1 %v2526_v29  ;;  %v80_v29 = vld [vmem:[%s4312_s0 + $0x1d8] sm:$0xff]  ;;  %v275_v33 = vpack.c.bf16 %v86_v28, %v79_v27  ;;  %v119_v63 = vld [vmem:[%s4312_s0 + $0x310] sm:$0xff]  ;;  %v126_v0 = vld [vmem:[%s4312_s0 + $0x348] sm:$0xff] }
  0x20   :  { %987 = vmatpush.bf16.msra.mxu2 %v2534_v30  ;;  %v87_v30 = vld [vmem:[%s4312_s0 + $0x210] sm:$0xff]  ;;  %v2553_v61 = vld [vmem:[%s4310_s1 + $0x118] sm:$0xff]  ;;  %v121_v3 = vld [vmem:[%s4312_s0 + $0x320] sm:$0xff] }
  0x21   :  { %1076 = vmatpush.bf16.msra.mxu3 %v2542_v31  ;;  %810 = vmatmul.bf16.vlgmr.msra.gmra.mxu0 %v245_v42  ;;  %v273_v31 = vpack.c.bf16 %v84_v24, %v77_v23  ;;  %v276_v34 = vpack.c.bf16 %v87_v30, %v80_v29  ;;  %v100_v42 = vld [vmem:[%s4312_s0 + $0x278] sm:$0xff]  ;;  %v127_v2 = vld [vmem:[%s4312_s0 + $0x350] sm:$0xff]  ;;  %v3059_v11 = vld [vmem:[%s4311_s2] ss:$0 sm:$0xff] }
  0x22   :  { %1158 = vmatpush.bf16.msrb.mxu0 %v2557_v41  ;;  %899 = vmatmul.bf16.vlgmr.msra.gmra.mxu1 %v246_v43  ;;  %v93_v41 = vld [vmem:[%s4312_s0 + $0x240] sm:$0xff]  ;;  %v94_v43 = vld [vmem:[%s4312_s0 + $0x248] sm:$0xff]  ;;  %v2561_v62 = vld [vmem:[%s4310_s1 + $0x158] sm:$0xff] }
  0x23   :  { %988 = vmatmul.bf16.vlgmr.msra.gmra.mxu2 %v247_v44  ;;  %1247 = vmatpush.bf16.msrb.mxu1 %v2565_v46  ;;  %v101_v44 = vld [vmem:[%s4312_s0 + $0x280] sm:$0xff]  ;;  %v120_v1 = vld [vmem:[%s4312_s0 + $0x318] sm:$0xff]  ;;  %v134_v14 = vld [vmem:[%s4312_s0 + $0x388] sm:$0xff] }
  0x24   :  { %1343 = vmatpush.bf16.msrb.mxu2 %v2566_v40  ;;  %1077 = vmatmul.bf16.vlgmr.msra.gmra.mxu3 %v248_v45  ;;  %v99_v40 = vld [vmem:[%s4312_s0 + $0x270] sm:$0xff]  ;;  %v280_v45 = vpack.c.bf16 %v98_v38, %v91_v37  ;;  %v128_v4 = vld [vmem:[%s4312_s0 + $0x358] sm:$0xff]  ;;  %v133_v12 = vld [vmem:[%s4312_s0 + $0x380] sm:$0xff] }
  0x25   :  { %v281_v46 = vpack.c.bf16 %v99_v40, %v92_v39  ;;  %v140_v13 = vld [vmem:[%s4312_s0 + $0x3b8] sm:$0xff]  ;;  %v141_v15 = vld [vmem:[%s4312_s0 + $0x3c0] sm:$0xff]  ;;  %v135_v16 = vld [vmem:[%s4312_s0 + $0x390] sm:$0xff] }
  0x26   :  { %1159 = vmatpush.bf16.msrb.mxu0 %v2556_v47  ;;  %v282_v47 = vpack.c.bf16 %v100_v42, %v93_v41  ;;  %v142_v17 = vld [vmem:[%s4312_s0 + $0x3c8] sm:$0xff]  ;;  %v136_v18 = vld [vmem:[%s4312_s0 + $0x398] sm:$0xff]  ;;  %v2552_v28 = vld [vmem:[%s4310_s1 + $0x110] sm:$0xff] }
  0x27   :  { %1248 = vmatpush.bf16.msrb.mxu1 %v2564_v48  ;;  %v283_v48 = vpack.c.bf16 %v101_v44, %v94_v43  ;;  %v303_v24 = vpack.c.bf16 %v142_v17, %v135_v16  ;;  %v147_v38 = vld [vmem:[%s4312_s0 + $0x3f0] sm:$0xff]  ;;  %v154_v39 = vld [vmem:[%s4312_s0 + $0x428] sm:$0xff]  ;;  %v148_v40 = vld [vmem:[%s4312_s0 + $0x3f8] sm:$0xff] }
  0x28   :  { %v155_v41 = vld [vmem:[%s4312_s0 + $0x430] sm:$0xff]  ;;  %v149_v42 = vld [vmem:[%s4312_s0 + $0x400] sm:$0xff]  ;;  %v156_v43 = vld [vmem:[%s4312_s0 + $0x438] sm:$0xff] }
  0x29   :  { %v150_v44 = vld [vmem:[%s4312_s0 + $0x408] sm:$0xff] }
  0x2a   :  { %1160 = vmatpush.bf16.msrb.mxu0 %v2555_v9  ;;  %v296_v9 = vpack.c.bf16 %v128_v4, %v121_v3  ;;  %v161_v3 = vld [vmem:[%s4312_s0 + $0x460] sm:$0xff]  ;;  %v168_v4 = vld [vmem:[%s4312_s0 + $0x498] sm:$0xff] }
  0x2b   :  { %1249 = vmatpush.bf16.msrb.mxu1 %v2563_v10 }
  0x2e   :  { %1161 = vmatpush.bf16.msrb.mxu0 %v2554_v35 }
  0x2f   :  { %1250 = vmatpush.bf16.msrb.mxu1 %v2562_v36 }
  0x31   :  { %815 = vmatmul.bf16.gmra.mxu0 %v252_v57  ;;  %v287_v57 = vpack.c.bf16 %v112_v50, %v105_v49  ;;  %v309_v49 = vpack.c.bf16 %v155_v41, %v148_v40  ;;  %v184_v40 = vld [vmem:[%s4312_s0 + $0x518] sm:$0xff]  ;;  %v178_v41 = vld [vmem:[%s4312_s0 + $0x4e8] sm:$0xff] }
  0x32   :  { %904 = vmatmul.bf16.gmra.mxu1 %v253_v58  ;;  %v288_v58 = vpack.c.bf16 %v113_v52, %v106_v51  ;;  %1162 = vmatpush.bf16.msrb.mxu0 %v2553_v61 }
  0x33   :  { %993 = vmatmul.bf16.gmra.mxu2 %v254_v59  ;;  %v289_v59 = vpack.c.bf16 %v114_v54, %v107_v53  ;;  %1251 = vmatpush.bf16.msrb.mxu1 %v2561_v62  ;;  %v310_v53 = vpack.c.bf16 %v156_v43, %v149_v42  ;;  %v185_v42 = vld [vmem:[%s4312_s0 + $0x520] sm:$0xff] }
  0x34   :  { %1082 = vmatmul.bf16.gmra.mxu3 %v255_v60  ;;  %v290_v60 = vpack.c.bf16 %v115_v56, %v108_v55  ;;  %v2574_v55 = vld [vmem:[%s4313_s3 + $0x38] sm:$0xff] }
  0x35   :  { %2117 = vmatpush.bf16.msrb.mxu3 %v2574_v55 }
  0x36   :  { %1163 = vmatpush.bf16.msrb.mxu0 %v2552_v28 }
  0x41   :  { %820 = vmatmul.bf16.gmra.mxu0 %v259_v5  ;;  %v122_v5 = vld [vmem:[%s4312_s0 + $0x328] sm:$0xff] }
  0x42   :  { %909 = vmatmul.bf16.gmra.mxu1 %v260_v6  ;;  %v129_v6 = vld [vmem:[%s4312_s0 + $0x360] sm:$0xff] }
  0x43   :  { %998 = vmatmul.bf16.gmra.mxu2 %v261_v7  ;;  %v294_v7 = vpack.c.bf16 %v126_v0, %v119_v63  ;;  %v297_v10 = vpack.c.bf16 %v129_v6, %v122_v5  ;;  %v162_v5 = vld [vmem:[%s4312_s0 + $0x468] sm:$0xff]  ;;  %v169_v6 = vld [vmem:[%s4312_s0 + $0x4a0] sm:$0xff] }
  0x44   :  { %1087 = vmatmul.bf16.gmra.mxu3 %v262_v8  ;;  %v295_v8 = vpack.c.bf16 %v127_v2, %v120_v1 }
  0x51   :  { %825 = vmatmul.bf16.gmra.mxu0 %v266_v19  ;;  %v143_v19 = vld [vmem:[%s4312_s0 + $0x3d0] sm:$0xff] }
  0x52   :  { %914 = vmatmul.bf16.gmra.mxu1 %v267_v20  ;;  %v301_v20 = vpack.c.bf16 %v140_v13, %v133_v12  ;;  %v304_v25 = vpack.c.bf16 %v143_v19, %v136_v18 }
  0x53   :  { %1003 = vmatmul.bf16.gmra.mxu2 %v268_v21  ;;  %v302_v21 = vpack.c.bf16 %v141_v15, %v134_v14  ;;  %v315_v14 = vpack.c.bf16 %v168_v4, %v161_v3  ;;  %v316_v15 = vpack.c.bf16 %v169_v6, %v162_v5  ;;  %v196_v3 = vld [vmem:[%s4312_s0 + $0x578] sm:$0xff]  ;;  %v190_v4 = vld [vmem:[%s4312_s0 + $0x548] sm:$0xff]  ;;  %v197_v5 = vld [vmem:[%s4312_s0 + $0x580] sm:$0xff] }
  0x54   :  { %1092 = vmatmul.bf16.gmra.mxu3 %v269_v22  ;;  %v191_v6 = vld [vmem:[%s4312_s0 + $0x550] sm:$0xff] }
  0x61   :  { %830 = vmatmul.bf16.gmra.mxu0 %v273_v31 }
  0x62   :  { %919 = vmatmul.bf16.gmra.mxu1 %v274_v32 }
  0x63   :  { %1008 = vmatmul.bf16.gmra.mxu2 %v275_v33 }
  0x64   :  { %1097 = vmatmul.bf16.gmra.mxu3 %v276_v34  ;;  %v2560_v34 = vld [vmem:[%s4310_s1 + $0x150] sm:$0xff] }
  0x65   :  { %1252 = vmatpush.bf16.msrb.mxu1 %v2560_v34  ;;  %v175_v34 = vld [vmem:[%s4312_s0 + $0x4d0] sm:$0xff] }
  0x71   :  { %835 = vmatmul.bf16.gmra.mxu0 %v280_v45  ;;  %v157_v45 = vld [vmem:[%s4312_s0 + $0x440] sm:$0xff] }
  0x72   :  { %924 = vmatmul.bf16.gmra.mxu1 %v281_v46  ;;  %v311_v54 = vpack.c.bf16 %v157_v45, %v150_v44 }
  0x73   :  { %1013 = vmatmul.bf16.gmra.mxu2 %v282_v47 }
  0x74   :  { %1102 = vmatmul.bf16.gmra.mxu3 %v283_v48  ;;  %v308_v48 = vpack.c.bf16 %v154_v39, %v147_v38  ;;  %v183_v38 = vld [vmem:[%s4312_s0 + $0x510] sm:$0xff]  ;;  %v177_v39 = vld [vmem:[%s4312_s0 + $0x4e0] sm:$0xff] }
  0x81   :  { %840 = vmatmul.bf16.gmra.mxu0 %v287_v57 }
  0x82   :  { %929 = vmatmul.bf16.gmra.mxu1 %v288_v58 }
  0x83   :  { %1018 = vmatmul.bf16.gmra.mxu2 %v289_v59 }
  0x84   :  { %1107 = vmatmul.bf16.gmra.mxu3 %v290_v60 }
  0x91   :  { %845 = vmatmul.bf16.gmra.mxu0 %v294_v7  ;;  %v163_v7 = vld [vmem:[%s4312_s0 + $0x470] sm:$0xff] }
  0x92   :  { %934 = vmatmul.bf16.gmra.mxu1 %v295_v8  ;;  %v170_v8 = vld [vmem:[%s4312_s0 + $0x4a8] sm:$0xff] }
  0x93   :  { %1023 = vmatmul.bf16.gmra.mxu2 %v296_v9  ;;  %v164_v9 = vld [vmem:[%s4312_s0 + $0x478] sm:$0xff]  ;;  %v317_v19 = vpack.c.bf16 %v170_v8, %v163_v7  ;;  %v198_v7 = vld [vmem:[%s4312_s0 + $0x588] sm:$0xff] }
  0x94   :  { %1112 = vmatmul.bf16.gmra.mxu3 %v297_v10  ;;  %v171_v10 = vld [vmem:[%s4312_s0 + $0x4b0] sm:$0xff]  ;;  %v192_v8 = vld [vmem:[%s4312_s0 + $0x558] sm:$0xff] }
  0x9e   :  { %v811_v22 = vpop.f32.mrf.mxu0 }
  0x9f   :  { %v900_v23 = vpop.f32.mrf.mxu1  ;;  %v812_v26 = vadd.f32 %v3059_v11, %v811_v22 }
  0xa1   :  { %v901_v27 = vadd.f32 %v900_v23, %v812_v26  ;;  %850 = vmatmul.bf16.gmra.mxu0 %v301_v20  ;;  %v318_v20 = vpack.c.bf16 %v171_v10, %v164_v9  ;;  %v199_v9 = vld [vmem:[%s4312_s0 + $0x590] sm:$0xff] }
  0xa2   :  { %939 = vmatmul.bf16.gmra.mxu1 %v302_v21 }
  0xa3   :  { %1028 = vmatmul.bf16.gmra.mxu2 %v303_v24  ;;  %v2551_v24 = vld [vmem:[%s4310_s1 + $0x108] sm:$0xff] }
  0xa4   :  { %1117 = vmatmul.bf16.gmra.mxu3 %v304_v25  ;;  %1164 = vmatpush.bf16.msrb.mxu0 %v2551_v24  ;;  %v2550_v24 = vld [vmem:[%s4310_s1 + $0x100] sm:$0xff] }
  0xa6   :  { %v989_v29 = vpop.f32.mrf.mxu2  ;;  %v813_v32 = vpop.f32.mrf.mxu0 }
  0xa7   :  { %v1078_v30 = vpop.f32.mrf.mxu3  ;;  %v990_v31 = vadd.f32 %v989_v29, %v901_v27  ;;  %v902_v33 = vpop.f32.mrf.mxu1  ;;  %v814_v35 = vadd.f32 %v3059_v11, %v813_v32 }
  0xa8   :  { %1165 = vmatpush.bf16.msrb.mxu0 %v2550_v24 }
  0xa9   :  { %v3093_v36 = vadd.f32 %v1078_v30, %v990_v31  ;;  %v903_v37 = vadd.f32 %v902_v33, %v814_v35  ;;  %v2559_v30 = vld [vmem:[%s4310_s1 + $0x148] sm:$0xff] }
  0xaa   :  { %1253 = vmatpush.bf16.msrb.mxu1 %v2559_v30  ;;  %v182_v35 = vld [vmem:[%s4312_s0 + $0x508] sm:$0xff]  ;;  %v2558_v30 = vld [vmem:[%s4310_s1 + $0x140] sm:$0xff] }
  0xab   :  { %v322_v45 = vpack.c.bf16 %v182_v35, %v175_v34  ;;  %v203_v35 = vld [vmem:[%s4312_s0 + $0x5b0] sm:$0xff] }
  0xae   :  { %v991_v46 = vpop.f32.mrf.mxu2  ;;  %v816_v51 = vpop.f32.mrf.mxu0  ;;  %1254 = vmatpush.bf16.msrb.mxu1 %v2558_v30 }
  0xaf   :  { %v1080_v47 = vpop.f32.mrf.mxu3  ;;  %v992_v50 = vadd.f32 %v991_v46, %v903_v37  ;;  %v905_v52 = vpop.f32.mrf.mxu1  ;;  %v817_v56 = vadd.f32 %v3059_v11, %v816_v51  ;;  %v176_v37 = vld [vmem:[%s4312_s0 + $0x4d8] sm:$0xff]  ;;  %v325_v51 = vpack.c.bf16 %v185_v42, %v178_v41  ;;  %v206_v42 = vld [vmem:[%s4312_s0 + $0x5c8] sm:$0xff] }
  0xb0   :  { %v323_v46 = vpack.c.bf16 %v183_v38, %v176_v37  ;;  %v210_v37 = vld [vmem:[%s4312_s0 + $0x5e8] sm:$0xff]  ;;  %v204_v38 = vld [vmem:[%s4312_s0 + $0x5b8] sm:$0xff] }
  0xb1   :  { %v3123_v57 = vadd.f32 %v1080_v47, %v992_v50  ;;  %v906_v58 = vadd.f32 %v905_v52, %v817_v56  ;;  %855 = vmatmul.bf16.gmra.mxu0 %v308_v48  ;;  %v324_v50 = vpack.c.bf16 %v184_v40, %v177_v39  ;;  %v2573_v52 = vld [vmem:[%s4313_s3 + $0x30] sm:$0xff]  ;;  %v205_v40 = vld [vmem:[%s4312_s0 + $0x5c0] sm:$0xff]  ;;  %v212_v41 = vld [vmem:[%s4312_s0 + $0x5f8] sm:$0xff] }
  0xb2   :  { %944 = vmatmul.bf16.gmra.mxu1 %v309_v49  ;;  %2118 = vmatpush.bf16.msrb.mxu3 %v2573_v52  ;;  %v211_v39 = vld [vmem:[%s4312_s0 + $0x5f0] sm:$0xff] }
  0xb3   :  { %1033 = vmatmul.bf16.gmra.mxu2 %v310_v53 }
  0xb4   :  { %1122 = vmatmul.bf16.gmra.mxu3 %v311_v54 }
  0xb6   :  { %v994_v59 = vpop.f32.mrf.mxu2  ;;  %v818_v62 = vpop.f32.mrf.mxu0 }
  0xb7   :  { %v1083_v60 = vpop.f32.mrf.mxu3  ;;  %v995_v61 = vadd.f32 %v994_v59, %v906_v58  ;;  %v907_v63 = vpop.f32.mrf.mxu1  ;;  %v819_v0 = vadd.f32 %v3059_v11, %v818_v62 }
  0xb9   :  { %v3126_v1 = vadd.f32 %v1083_v60, %v995_v61  ;;  %v908_v2 = vadd.f32 %v907_v63, %v819_v0 }
  0xbe   :  { %v996_v12 = vpop.f32.mrf.mxu2  ;;  %v821_v17 = vpop.f32.mrf.mxu0 }
  0xbf   :  { %v1085_v13 = vpop.f32.mrf.mxu3  ;;  %v997_v16 = vadd.f32 %v996_v12, %v908_v2  ;;  %v910_v18 = vpop.f32.mrf.mxu1  ;;  %v822_v21 = vadd.f32 %v3059_v11, %v821_v17  ;;  %v189_v2 = vld [vmem:[%s4312_s0 + $0x540] sm:$0xff] }
  0xc1   :  { %v3153_v22 = vadd.f32 %v1085_v13, %v997_v16  ;;  %v911_v23 = vadd.f32 %v910_v18, %v822_v21  ;;  %860 = vmatmul.bf16.gmra.mxu0 %v315_v14  ;;  %v329_v13 = vpack.c.bf16 %v196_v3, %v189_v2  ;;  %v330_v14 = vpack.c.bf16 %v197_v5, %v190_v4  ;;  %v217_v4 = vld [vmem:[%s4312_s0 + $0x620] sm:$0xff]  ;;  %v224_v5 = vld [vmem:[%s4312_s0 + $0x658] sm:$0xff] }
  0xc2   :  { %949 = vmatmul.bf16.gmra.mxu1 %v316_v15  ;;  %v331_v18 = vpack.c.bf16 %v198_v7, %v191_v6  ;;  %v218_v6 = vld [vmem:[%s4312_s0 + $0x628] sm:$0xff]  ;;  %v225_v7 = vld [vmem:[%s4312_s0 + $0x660] sm:$0xff] }
  0xc3   :  { %1038 = vmatmul.bf16.gmra.mxu2 %v317_v19  ;;  %v332_v19 = vpack.c.bf16 %v199_v9, %v192_v8  ;;  %v219_v8 = vld [vmem:[%s4312_s0 + $0x630] sm:$0xff]  ;;  %v226_v9 = vld [vmem:[%s4312_s0 + $0x668] sm:$0xff] }
  0xc4   :  { %1127 = vmatmul.bf16.gmra.mxu3 %v318_v20 }
  0xc6   :  { %v999_v25 = vpop.f32.mrf.mxu2  ;;  %v823_v28 = vpop.f32.mrf.mxu0 }
  0xc7   :  { %v1088_v26 = vpop.f32.mrf.mxu3  ;;  %v1000_v27 = vadd.f32 %v999_v25, %v911_v23  ;;  %v912_v29 = vpop.f32.mrf.mxu1  ;;  %v824_v31 = vadd.f32 %v3059_v11, %v823_v28 }
  0xc9   :  { %v3162_v32 = vadd.f32 %v1088_v26, %v1000_v27  ;;  %v913_v33 = vadd.f32 %v912_v29, %v824_v31 }
  0xce   :  { %v1001_v43 = vpop.f32.mrf.mxu2  ;;  %v826_v48 = vpop.f32.mrf.mxu0 }
  0xcf   :  { %v1090_v44 = vpop.f32.mrf.mxu3  ;;  %v1002_v47 = vadd.f32 %v1001_v43, %v913_v33  ;;  %v915_v49 = vpop.f32.mrf.mxu1  ;;  %v827_v53 = vadd.f32 %v3059_v11, %v826_v48  ;;  %v213_v43 = vld [vmem:[%s4312_s0 + $0x600] sm:$0xff] }
  0xd0   :  { %v339_v52 = vpack.c.bf16 %v213_v43, %v206_v42  ;;  %v240_v42 = vld [vmem:[%s4312_s0 + $0x6d8] sm:$0xff]  ;;  %v234_v43 = vld [vmem:[%s4312_s0 + $0x6a8] sm:$0xff] }
  0xd1   :  { %v3192_v54 = vadd.f32 %v1090_v44, %v1002_v47  ;;  %v916_v55 = vadd.f32 %v915_v49, %v827_v53  ;;  %865 = vmatmul.bf16.gmra.mxu0 %v322_v45  ;;  %v337_v47 = vpack.c.bf16 %v211_v39, %v204_v38  ;;  %v2572_v53 = vld [vmem:[%s4313_s3 + $0x28] sm:$0xff]  ;;  %v232_v39 = vld [vmem:[%s4312_s0 + $0x698] sm:$0xff] }
  0xd2   :  { %954 = vmatmul.bf16.gmra.mxu1 %v323_v46  ;;  %v336_v46 = vpack.c.bf16 %v210_v37, %v203_v35  ;;  %2119 = vmatpush.bf16.msrb.mxu3 %v2572_v53  ;;  %v231_v37 = vld [vmem:[%s4312_s0 + $0x690] sm:$0xff]  ;;  %v238_v38 = vld [vmem:[%s4312_s0 + $0x6c8] sm:$0xff] }
  0xd3   :  { %1043 = vmatmul.bf16.gmra.mxu2 %v324_v50 }
  0xd4   :  { %1132 = vmatmul.bf16.gmra.mxu3 %v325_v51  ;;  %v338_v51 = vpack.c.bf16 %v212_v41, %v205_v40  ;;  %v239_v40 = vld [vmem:[%s4312_s0 + $0x6d0] sm:$0xff]  ;;  %v233_v41 = vld [vmem:[%s4312_s0 + $0x6a0] sm:$0xff] }
  0xd6   :  { %v1004_v56 = vpop.f32.mrf.mxu2  ;;  %v828_v60 = vpop.f32.mrf.mxu0 }
  0xd7   :  { %v1093_v58 = vpop.f32.mrf.mxu3  ;;  %v1005_v59 = vadd.f32 %v1004_v56, %v916_v55  ;;  %v917_v61 = vpop.f32.mrf.mxu1  ;;  %v829_v62 = vadd.f32 %v3059_v11, %v828_v60 }
  0xd9   :  { %v3195_v63 = vadd.f32 %v1093_v58, %v1005_v59  ;;  %v918_v0 = vadd.f32 %v917_v61, %v829_v62 }
  0xde   :  { %v1006_v10 = vpop.f32.mrf.mxu2  ;;  %v831_v16 = vpop.f32.mrf.mxu0 }
  0xdf   :  { %v1095_v12 = vpop.f32.mrf.mxu3  ;;  %v1007_v15 = vadd.f32 %v1006_v10, %v918_v0  ;;  %v920_v17 = vpop.f32.mrf.mxu1  ;;  %v832_v20 = vadd.f32 %v3059_v11, %v831_v16  ;;  %v220_v10 = vld [vmem:[%s4312_s0 + $0x638] sm:$0xff]  ;;  %v344_v16 = vpack.c.bf16 %v225_v7, %v218_v6 }
  0xe1   :  { %v3222_v21 = vadd.f32 %v1095_v12, %v1007_v15  ;;  %v921_v23 = vadd.f32 %v920_v17, %v832_v20  ;;  %870 = vmatmul.bf16.gmra.mxu0 %v329_v13  ;;  %v227_v12 = vld [vmem:[%s4312_s0 + $0x670] sm:$0xff]  ;;  %v343_v15 = vpack.c.bf16 %v224_v5, %v217_v4  ;;  %v345_v20 = vpack.c.bf16 %v226_v9, %v219_v8  ;;  %v25_v8 = vld [vmem:[%s4312_s0 + $0x20] sm:$0xff]  ;;  %v32_v9 = vld [vmem:[%s4312_s0 + $0x58] sm:$0xff] }
  0xe2   :  { %959 = vmatmul.bf16.gmra.mxu1 %v330_v14 }
  0xe3   :  { %1048 = vmatmul.bf16.gmra.mxu2 %v331_v18 }
  0xe4   :  { %1137 = vmatmul.bf16.gmra.mxu3 %v332_v19 }
  0xe6   :  { %v1009_v25 = vpop.f32.mrf.mxu2  ;;  %v833_v28 = vpop.f32.mrf.mxu0 }
  0xe7   :  { %v1098_v26 = vpop.f32.mrf.mxu3  ;;  %v1010_v27 = vadd.f32 %v1009_v25, %v921_v23  ;;  %v922_v29 = vpop.f32.mrf.mxu1  ;;  %v834_v31 = vadd.f32 %v3059_v11, %v833_v28  ;;  %v346_v23 = vpack.c.bf16 %v227_v12, %v220_v10  ;;  %v26_v10 = vld [vmem:[%s4312_s0 + $0x28] sm:$0xff]  ;;  %v33_v12 = vld [vmem:[%s4312_s0 + $0x60] sm:$0xff] }
  0xe9   :  { %v3231_v33 = vadd.f32 %v1098_v26, %v1010_v27  ;;  %v923_v34 = vadd.f32 %v922_v29, %v834_v31 }
  0xee   :  { %v1011_v44 = vpop.f32.mrf.mxu2  ;;  %v836_v49 = vpop.f32.mrf.mxu0 }
  0xef   :  { %v3257_v45 = vpop.f32.mrf.mxu3  ;;  %v3259_v48 = vadd.f32 %v1011_v44, %v923_v34  ;;  %v925_v50 = vpop.f32.mrf.mxu1  ;;  %v837_v55 = vadd.f32 %v3059_v11, %v836_v49  ;;  %v241_v44 = vld [vmem:[%s4312_s0 + $0x6e0] sm:$0xff]  ;;  %v350_v49 = vpack.c.bf16 %v238_v38, %v231_v37 }
  0xf1   :  { %v926_v56 = vadd.f32 %v925_v50, %v837_v55  ;;  %875 = vmatmul.bf16.gmra.mxu0 %v336_v46  ;;  %v351_v50 = vpack.c.bf16 %v239_v40, %v232_v39  ;;  %v352_v55 = vpack.c.bf16 %v240_v42, %v233_v41  ;;  %v39_v41 = vld [vmem:[%s4312_s0 + $0x90] sm:$0xff]  ;;  %v46_v42 = vld [vmem:[%s4312_s0 + $0xc8] sm:$0xff] }
  0xf2   :  { %964 = vmatmul.bf16.gmra.mxu1 %v337_v47 }
  0xf3   :  { %1053 = vmatmul.bf16.gmra.mxu2 %v338_v51 }
  0xf4   :  { %1142 = vmatmul.bf16.gmra.mxu3 %v339_v52 }
  0xf6   :  { %v1014_v58 = vpop.f32.mrf.mxu2  ;;  %v838_v61 = vpop.f32.mrf.mxu0 }
  0xf7   :  { %v1103_v59 = vpop.f32.mrf.mxu3  ;;  %v1015_v60 = vadd.f32 %v1014_v58, %v926_v56  ;;  %v927_v62 = vpop.f32.mrf.mxu1  ;;  %v839_v0 = vadd.f32 %v3059_v11, %v838_v61  ;;  %v353_v56 = vpack.c.bf16 %v241_v44, %v234_v43  ;;  %v2571_v58 = vld [vmem:[%s4313_s3 + $0x20] sm:$0xff]  ;;  %v40_v43 = vld [vmem:[%s4312_s0 + $0x98] sm:$0xff]  ;;  %v47_v44 = vld [vmem:[%s4312_s0 + $0xd0] sm:$0xff] }
  0xf8   :  { %2120 = vmatpush.bf16.msrb.mxu3 %v2571_v58 }
  0xf9   :  { %v3266_v2 = vadd.f32 %v1103_v59, %v1015_v60  ;;  %v928_v3 = vadd.f32 %v927_v62, %v839_v0 }
  0xfe   :  { %v1016_v13 = vpop.f32.mrf.mxu2  ;;  %v841_v18 = vpop.f32.mrf.mxu0 }
  0xff   :  { %v3292_v14 = vpop.f32.mrf.mxu3  ;;  %v3294_v17 = vadd.f32 %v1016_v13, %v928_v3  ;;  %v930_v19 = vpop.f32.mrf.mxu1  ;;  %v842_v24 = vadd.f32 %v3059_v11, %v841_v18  ;;  %v27_v13 = vld [vmem:[%s4312_s0 + $0x30] sm:$0xff] }
 0x101   :  { %v931_v25 = vadd.f32 %v930_v19, %v842_v24  ;;  %880 = vmatmul.bf16.gmra.mxu0 %v343_v15  ;;  %v34_v15 = vld [vmem:[%s4312_s0 + $0x68] sm:$0xff]  ;;  %v249_v19 = vpack.c.bf16 %v32_v9, %v25_v8 }
 0x102   :  { %969 = vmatmul.bf16.gmra.mxu1 %v344_v16 }
 0x103   :  { %1058 = vmatmul.bf16.gmra.mxu2 %v345_v20  ;;  %v250_v20 = vpack.c.bf16 %v33_v12, %v26_v10 }
 0x104   :  { %1147 = vmatmul.bf16.gmra.mxu3 %v346_v23 }
 0x106   :  { %v1019_v26 = vpop.f32.mrf.mxu2  ;;  %v843_v29 = vpop.f32.mrf.mxu0 }
 0x107   :  { %v1108_v27 = vpop.f32.mrf.mxu3  ;;  %v1020_v28 = vadd.f32 %v1019_v26, %v931_v25  ;;  %v932_v30 = vpop.f32.mrf.mxu1  ;;  %v844_v31 = vadd.f32 %v3059_v11, %v843_v29  ;;  %v251_v26 = vpack.c.bf16 %v34_v15, %v27_v13  ;;  %v53_v13 = vld [vmem:[%s4312_s0 + $0x100] sm:$0xff]  ;;  %v60_v15 = vld [vmem:[%s4312_s0 + $0x138] sm:$0xff] }
 0x109   :  { %v3298_v34 = vadd.f32 %v1108_v27, %v1020_v28  ;;  %v933_v35 = vadd.f32 %v932_v30, %v844_v31 }
 0x10e   :  { %v1021_v46 = vpop.f32.mrf.mxu2  ;;  %v846_v52 = vpop.f32.mrf.mxu0 }
 0x10f   :  { %v3324_v47 = vpop.f32.mrf.mxu3  ;;  %v3326_v51 = vadd.f32 %v1021_v46, %v933_v35  ;;  %v935_v53 = vpop.f32.mrf.mxu1  ;;  %v847_v59 = vadd.f32 %v3059_v11, %v846_v52  ;;  %v41_v46 = vld [vmem:[%s4312_s0 + $0xa0] sm:$0xff] }
 0x111   :  { %v936_v60 = vadd.f32 %v935_v53, %v847_v59  ;;  %885 = vmatmul.bf16.gmra.mxu0 %v350_v49  ;;  %v48_v49 = vld [vmem:[%s4312_s0 + $0xd8] sm:$0xff]  ;;  %v256_v53 = vpack.c.bf16 %v46_v42, %v39_v41 }
 0x112   :  { %974 = vmatmul.bf16.gmra.mxu1 %v351_v50 }
 0x113   :  { %1063 = vmatmul.bf16.gmra.mxu2 %v352_v55  ;;  %v257_v55 = vpack.c.bf16 %v47_v44, %v40_v43 }
 0x114   :  { %1152 = vmatmul.bf16.gmra.mxu3 %v353_v56 }
 0x116   :  { %v1024_v61 = vpop.f32.mrf.mxu2  ;;  %v848_v3 = vpop.f32.mrf.mxu0 }
 0x117   :  { %v1113_v62 = vpop.f32.mrf.mxu3  ;;  %v1025_v0 = vadd.f32 %v1024_v61, %v936_v60  ;;  %v937_v4 = vpop.f32.mrf.mxu1  ;;  %v849_v5 = vadd.f32 %v3059_v11, %v848_v3  ;;  %v258_v60 = vpack.c.bf16 %v48_v49, %v41_v46  ;;  %v2570_v61 = vld [vmem:[%s4313_s3 + $0x18] sm:$0xff] }
 0x118   :  { %2121 = vmatpush.bf16.msrb.mxu3 %v2570_v61  ;;  %v76_v61 = vld [vmem:[%s4312_s0 + $0x1b8] sm:$0xff] }
 0x119   :  { %v3333_v6 = vadd.f32 %v1113_v62, %v1025_v0  ;;  %v938_v7 = vadd.f32 %v937_v4, %v849_v5 }
 0x11e   :  { %v1026_v16 = vpop.f32.mrf.mxu2  ;;  %v851_v24 = vpop.f32.mrf.mxu0 }
 0x11f   :  { %v3353_v18 = vpop.f32.mrf.mxu3  ;;  %v3355_v23 = vadd.f32 %v1026_v16, %v938_v7  ;;  %v940_v25 = vpop.f32.mrf.mxu1  ;;  %v852_v27 = vadd.f32 %v3059_v11, %v851_v24  ;;  %v54_v16 = vld [vmem:[%s4312_s0 + $0x108] sm:$0xff] }
 0x120   :  { %v62_v24 = vld [vmem:[%s4312_s0 + $0x148] sm:$0xff] }
 0x121   :  { %v941_v28 = vadd.f32 %v940_v25, %v852_v27  ;;  %1166 = vmatmul.bf16.vlgmr.msrb.gmra.mxu0 %v249_v19  ;;  %v61_v19 = vld [vmem:[%s4312_s0 + $0x140] sm:$0xff]  ;;  %v263_v27 = vpack.c.bf16 %v60_v15, %v53_v13 }
 0x122   :  { %1255 = vmatmul.bf16.vlgmr.msrb.gmra.mxu1 %v250_v20  ;;  %v55_v20 = vld [vmem:[%s4312_s0 + $0x110] sm:$0xff] }
 0x123   :  { %2438 = vmatmul.msk.bf16.vlgmr.msrb.gmra.mxu2 %vm753_vm0, %v251_v26 }
 0x126   :  { %v1029_v29 = vpop.f32.mrf.mxu2  ;;  %v853_v35 = vpop.f32.mrf.mxu0 }
 0x127   :  { %v1118_v30 = vpop.f32.mrf.mxu3  ;;  %v1030_v31 = vadd.f32 %v1029_v29, %v941_v28  ;;  %v942_v37 = vpop.f32.mrf.mxu1  ;;  %v854_v38 = vadd.f32 %v3059_v11, %v853_v35  ;;  %v264_v28 = vpack.c.bf16 %v61_v19, %v54_v16  ;;  %v265_v35 = vpack.c.bf16 %v62_v24, %v55_v20 }
 0x129   :  { %v3360_v39 = vadd.f32 %v1118_v30, %v1030_v31  ;;  %v943_v40 = vadd.f32 %v942_v37, %v854_v38 }
 0x12e   :  { %v1031_v50 = vpop.f32.mrf.mxu2  ;;  %v856_v58 = vpop.f32.mrf.mxu0 }
 0x12f   :  { %v3380_v52 = vpop.f32.mrf.mxu3  ;;  %v3382_v56 = vadd.f32 %v1031_v50, %v943_v40  ;;  %v945_v59 = vpop.f32.mrf.mxu1  ;;  %v857_v62 = vadd.f32 %v3059_v11, %v856_v58  ;;  %v68_v58 = vld [vmem:[%s4312_s0 + $0x178] sm:$0xff] }
 0x131   :  { %v946_v0 = vadd.f32 %v945_v59, %v857_v62  ;;  %1171 = vmatmul.bf16.gmra.mxu0 %v256_v53  ;;  %v67_v53 = vld [vmem:[%s4312_s0 + $0x170] sm:$0xff] }
 0x132   :  { %1260 = vmatmul.bf16.gmra.mxu1 %v257_v55  ;;  %v74_v55 = vld [vmem:[%s4312_s0 + $0x1a8] sm:$0xff]  ;;  %v75_v59 = vld [vmem:[%s4312_s0 + $0x1b0] sm:$0xff] }
 0x133   :  { %2439 = vmatmul.msk.bf16.gmra.mxu2 %vm753_vm0, %v258_v60  ;;  %v69_v60 = vld [vmem:[%s4312_s0 + $0x180] sm:$0xff] }
 0x136   :  { %v1034_v3 = vpop.f32.mrf.mxu2  ;;  %v858_v7 = vpop.f32.mrf.mxu0 }
 0x137   :  { %v1123_v4 = vpop.f32.mrf.mxu3  ;;  %v1035_v5 = vadd.f32 %v1034_v3, %v946_v0  ;;  %v947_v8 = vpop.f32.mrf.mxu1  ;;  %v859_v9 = vadd.f32 %v3059_v11, %v858_v7  ;;  %v270_v3 = vpack.c.bf16 %v74_v55, %v67_v53 }
 0x139   :  { %v3390_v10 = vadd.f32 %v1123_v4, %v1035_v5  ;;  %v948_v12 = vadd.f32 %v947_v8, %v859_v9  ;;  %v271_v4 = vpack.c.bf16 %v75_v59, %v68_v58  ;;  %v272_v9 = vpack.c.bf16 %v76_v61, %v69_v60 }
 0x13e   :  { %v1036_v25 = vpop.f32.mrf.mxu2  ;;  %v861_v30 = vpop.f32.mrf.mxu0 }
 0x13f   :  { %v3410_v26 = vpop.f32.mrf.mxu3  ;;  %v3412_v29 = vadd.f32 %v1036_v25, %v948_v12  ;;  %v950_v31 = vpop.f32.mrf.mxu1  ;;  %v862_v37 = vadd.f32 %v3059_v11, %v861_v30  ;;  %v2569_v12 = vld [vmem:[%s4313_s3 + $0x10] sm:$0xff] }
 0x140   :  { %2122 = vmatpush.bf16.msrb.mxu3 %v2569_v12 }
 0x141   :  { %v951_v38 = vadd.f32 %v950_v31, %v862_v37  ;;  %1176 = vmatmul.bf16.gmra.mxu0 %v263_v27  ;;  %v81_v31 = vld [vmem:[%s4312_s0 + $0x1e0] sm:$0xff]  ;;  %v82_v37 = vld [vmem:[%s4312_s0 + $0x1e8] sm:$0xff] }
 0x142   :  { %1265 = vmatmul.bf16.gmra.mxu1 %v264_v28 }
 0x143   :  { %2440 = vmatmul.msk.bf16.gmra.mxu2 %vm753_vm0, %v265_v35  ;;  %v88_v35 = vld [vmem:[%s4312_s0 + $0x218] sm:$0xff] }
 0x146   :  { %v1039_v40 = vpop.f32.mrf.mxu2  ;;  %v863_v43 = vpop.f32.mrf.mxu0 }
 0x147   :  { %v1128_v41 = vpop.f32.mrf.mxu3  ;;  %v1040_v42 = vadd.f32 %v1039_v40, %v951_v38  ;;  %v952_v44 = vpop.f32.mrf.mxu1  ;;  %v864_v46 = vadd.f32 %v3059_v11, %v863_v43  ;;  %v89_v38 = vld [vmem:[%s4312_s0 + $0x220] sm:$0xff]  ;;  %v83_v40 = vld [vmem:[%s4312_s0 + $0x1f0] sm:$0xff] }
 0x149   :  { %v3417_v49 = vadd.f32 %v1128_v41, %v1040_v42  ;;  %v953_v50 = vadd.f32 %v952_v44, %v864_v46  ;;  %v90_v41 = vld [vmem:[%s4312_s0 + $0x228] sm:$0xff]  ;;  %v277_v44 = vpack.c.bf16 %v88_v35, %v81_v31  ;;  %v278_v46 = vpack.c.bf16 %v89_v38, %v82_v37 }
 0x14a   :  { %v279_v58 = vpack.c.bf16 %v90_v41, %v83_v40  ;;  %v2568_v41 = vld [vmem:[%s4313_s3 + $0x8] sm:$0xff] }
 0x14b   :  { %2123 = vmatpush.bf16.msrb.mxu3 %v2568_v41 }
 0x14e   :  { %v1041_v62 = vpop.f32.mrf.mxu2  ;;  %v866_v7 = vpop.f32.mrf.mxu0 }
 0x14f   :  { %v3437_v0 = vpop.f32.mrf.mxu3  ;;  %v3439_v5 = vadd.f32 %v1041_v62, %v953_v50  ;;  %v955_v8 = vpop.f32.mrf.mxu1  ;;  %v867_v13 = vadd.f32 %v3059_v11, %v866_v7 }
 0x151   :  { %v956_v15 = vadd.f32 %v955_v8, %v867_v13  ;;  %1181 = vmatmul.bf16.gmra.mxu0 %v270_v3  ;;  %v95_v13 = vld [vmem:[%s4312_s0 + $0x250] sm:$0xff] }
 0x152   :  { %1270 = vmatmul.bf16.gmra.mxu1 %v271_v4 }
 0x153   :  { %2441 = vmatmul.msk.bf16.gmra.mxu2 %vm753_vm0, %v272_v9 }
 0x156   :  { %v1044_v16 = vpop.f32.mrf.mxu2  ;;  %v868_v24 = vpop.f32.mrf.mxu0 }
 0x157   :  { %v1133_v19 = vpop.f32.mrf.mxu3  ;;  %v1045_v20 = vadd.f32 %v1044_v16, %v956_v15  ;;  %v957_v25 = vpop.f32.mrf.mxu1  ;;  %v869_v27 = vadd.f32 %v3059_v11, %v868_v24  ;;  %v102_v15 = vld [vmem:[%s4312_s0 + $0x288] sm:$0xff]  ;;  %v96_v16 = vld [vmem:[%s4312_s0 + $0x258] sm:$0xff] }
 0x158   :  { %v104_v24 = vld [vmem:[%s4312_s0 + $0x298] sm:$0xff] }
 0x159   :  { %v3447_v28 = vadd.f32 %v1133_v19, %v1045_v20  ;;  %v958_v30 = vadd.f32 %v957_v25, %v869_v27  ;;  %v103_v19 = vld [vmem:[%s4312_s0 + $0x290] sm:$0xff]  ;;  %v97_v20 = vld [vmem:[%s4312_s0 + $0x260] sm:$0xff] }
 0x15a   :  { %v285_v31 = vpack.c.bf16 %v103_v19, %v96_v16  ;;  %v286_v40 = vpack.c.bf16 %v104_v24, %v97_v20 }
 0x15e   :  { %v1046_v42 = vpop.f32.mrf.mxu2  ;;  %v871_v53 = vpop.f32.mrf.mxu0 }
 0x15f   :  { %v3467_v43 = vpop.f32.mrf.mxu3  ;;  %v3469_v50 = vadd.f32 %v1046_v42, %v958_v30  ;;  %v960_v55 = vpop.f32.mrf.mxu1  ;;  %v872_v59 = vadd.f32 %v3059_v11, %v871_v53  ;;  %v284_v30 = vpack.c.bf16 %v102_v15, %v95_v13  ;;  %v118_v13 = vld [vmem:[%s4312_s0 + $0x308] sm:$0xff] }
 0x161   :  { %v961_v60 = vadd.f32 %v960_v55, %v872_v59  ;;  %1186 = vmatmul.bf16.gmra.mxu0 %v277_v44 }
 0x162   :  { %1275 = vmatmul.bf16.gmra.mxu1 %v278_v46 }
 0x163   :  { %2442 = vmatmul.msk.bf16.gmra.mxu2 %vm753_vm0, %v279_v58 }
 0x166   :  { %v1049_v61 = vpop.f32.mrf.mxu2  ;;  %v873_v4 = vpop.f32.mrf.mxu0 }
 0x167   :  { %v1138_v62 = vpop.f32.mrf.mxu3  ;;  %v1050_v3 = vadd.f32 %v1049_v61, %v961_v60  ;;  %v962_v7 = vpop.f32.mrf.mxu1  ;;  %v874_v8 = vadd.f32 %v3059_v11, %v873_v4  ;;  %v116_v4 = vld [vmem:[%s4312_s0 + $0x2f8] sm:$0xff] }
 0x169   :  { %v3474_v9 = vadd.f32 %v1138_v62, %v1050_v3  ;;  %v963_v12 = vadd.f32 %v962_v7, %v874_v8  ;;  %v109_v3 = vld [vmem:[%s4312_s0 + $0x2c0] sm:$0xff]  ;;  %v110_v7 = vld [vmem:[%s4312_s0 + $0x2c8] sm:$0xff] }
 0x16a   :  { %v117_v8 = vld [vmem:[%s4312_s0 + $0x300] sm:$0xff]  ;;  %v291_v19 = vpack.c.bf16 %v116_v4, %v109_v3  ;;  %v131_v3 = vld [vmem:[%s4312_s0 + $0x370] sm:$0xff] }
 0x16b   :  { %v292_v20 = vpack.c.bf16 %v117_v8, %v110_v7  ;;  %v125_v4 = vld [vmem:[%s4312_s0 + $0x340] sm:$0xff]  ;;  %v132_v7 = vld [vmem:[%s4312_s0 + $0x378] sm:$0xff] }
 0x16e   :  { %v1051_v25 = vpop.f32.mrf.mxu2  ;;  %v876_v37 = vpop.f32.mrf.mxu0 }
 0x16f   :  { %v3494_v27 = vpop.f32.mrf.mxu3  ;;  %v3496_v35 = vadd.f32 %v1051_v25, %v963_v12  ;;  %v965_v38 = vpop.f32.mrf.mxu1  ;;  %v877_v42 = vadd.f32 %v3059_v11, %v876_v37  ;;  %v111_v12 = vld [vmem:[%s4312_s0 + $0x2d0] sm:$0xff] }
 0x171   :  { %v966_v44 = vadd.f32 %v965_v38, %v877_v42  ;;  %1191 = vmatmul.bf16.gmra.mxu0 %v284_v30 }
 0x172   :  { %1280 = vmatmul.bf16.gmra.mxu1 %v285_v31  ;;  %v293_v31 = vpack.c.bf16 %v118_v13, %v111_v12 }
 0x173   :  { %2443 = vmatmul.msk.bf16.gmra.mxu2 %vm753_vm0, %v286_v40 }
 0x176   :  { %v1054_v46 = vpop.f32.mrf.mxu2  ;;  %v878_v58 = vpop.f32.mrf.mxu0 }
 0x177   :  { %v1143_v53 = vpop.f32.mrf.mxu3  ;;  %v1055_v55 = vadd.f32 %v1054_v46, %v966_v44  ;;  %v967_v59 = vpop.f32.mrf.mxu1  ;;  %v879_v60 = vadd.f32 %v3059_v11, %v878_v58 }
 0x179   :  { %v3504_v61 = vadd.f32 %v1143_v53, %v1055_v55  ;;  %v968_v62 = vadd.f32 %v967_v59, %v879_v60  ;;  %v123_v59 = vld [vmem:[%s4312_s0 + $0x330] sm:$0xff]  ;;  %v130_v60 = vld [vmem:[%s4312_s0 + $0x368] sm:$0xff] }
 0x17a   :  { %v298_v13 = vpack.c.bf16 %v130_v60, %v123_v59  ;;  %v137_v59 = vld [vmem:[%s4312_s0 + $0x3a0] sm:$0xff]  ;;  %v144_v60 = vld [vmem:[%s4312_s0 + $0x3d8] sm:$0xff] }
 0x17e   :  { %v1056_v15 = vpop.f32.mrf.mxu2  ;;  %v881_v25 = vpop.f32.mrf.mxu0 }
 0x17f   :  { %v3524_v16 = vpop.f32.mrf.mxu3  ;;  %v3526_v24 = vadd.f32 %v1056_v15, %v968_v62  ;;  %v970_v30 = vpop.f32.mrf.mxu1  ;;  %v882_v37 = vadd.f32 %v3059_v11, %v881_v25  ;;  %v124_v62 = vld [vmem:[%s4312_s0 + $0x338] sm:$0xff] }
 0x180   :  { %v299_v15 = vpack.c.bf16 %v131_v3, %v124_v62  ;;  %v138_v62 = vld [vmem:[%s4312_s0 + $0x3a8] sm:$0xff]  ;;  %v145_v3 = vld [vmem:[%s4312_s0 + $0x3e0] sm:$0xff] }
 0x181   :  { %v971_v38 = vadd.f32 %v970_v30, %v882_v37  ;;  %1196 = vmatmul.bf16.gmra.mxu0 %v291_v19  ;;  %v300_v30 = vpack.c.bf16 %v132_v7, %v125_v4  ;;  %v146_v4 = vld [vmem:[%s4312_s0 + $0x3e8] sm:$0xff] }
 0x182   :  { %1285 = vmatmul.bf16.gmra.mxu1 %v292_v20 }
 0x183   :  { %2444 = vmatmul.msk.bf16.gmra.mxu2 %vm753_vm0, %v293_v31 }
 0x186   :  { %v1059_v40 = vpop.f32.mrf.mxu2  ;;  %v883_v44 = vpop.f32.mrf.mxu0 }
 0x187   :  { %v1148_v41 = vpop.f32.mrf.mxu3  ;;  %v1060_v42 = vadd.f32 %v1059_v40, %v971_v38  ;;  %v972_v46 = vpop.f32.mrf.mxu1  ;;  %v884_v53 = vadd.f32 %v3059_v11, %v883_v44 }
 0x189   :  { %v3531_v55 = vadd.f32 %v1148_v41, %v1060_v42  ;;  %v973_v58 = vadd.f32 %v972_v46, %v884_v53 }
 0x18e   :  { %v1061_v8 = vpop.f32.mrf.mxu2  ;;  %v886_v20 = vpop.f32.mrf.mxu0 }
 0x18f   :  { %v3551_v12 = vpop.f32.mrf.mxu3  ;;  %v3553_v19 = vadd.f32 %v1061_v8, %v973_v58  ;;  %v975_v25 = vpop.f32.mrf.mxu1  ;;  %v887_v31 = vadd.f32 %v3059_v11, %v886_v20  ;;  %v305_v8 = vpack.c.bf16 %v144_v60, %v137_v59  ;;  %v158_v59 = vld [vmem:[%s4312_s0 + $0x448] sm:$0xff]  ;;  %v152_v60 = vld [vmem:[%s4312_s0 + $0x418] sm:$0xff] }
 0x190   :  { %4316 = vst [vmem:[#allocation2_spill] sm:$0xff] %v3551_v12 }
 0x191   :  { %v976_v37 = vadd.f32 %v975_v25, %v887_v31  ;;  %1201 = vmatmul.bf16.gmra.mxu0 %v298_v13  ;;  %v306_v13 = vpack.c.bf16 %v145_v3, %v138_v62  ;;  %v159_v62 = vld [vmem:[%s4312_s0 + $0x450] sm:$0xff]  ;;  %v160_v3 = vld [vmem:[%s4312_s0 + $0x458] sm:$0xff] }
 0x192   :  { %1290 = vmatmul.bf16.gmra.mxu1 %v299_v15 }
 0x193   :  { %2445 = vmatmul.msk.bf16.gmra.mxu2 %vm753_vm0, %v300_v30 }
 0x196   :  { %v1064_v38 = vpop.f32.mrf.mxu2  ;;  %v888_v42 = vpop.f32.mrf.mxu0 }
 0x197   :  { %v1153_v40 = vpop.f32.mrf.mxu3  ;;  %v1065_v41 = vadd.f32 %v1064_v38, %v976_v37  ;;  %v977_v44 = vpop.f32.mrf.mxu1  ;;  %v889_v46 = vadd.f32 %v3059_v11, %v888_v42  ;;  %v139_v11 = vld [vmem:[%s4312_s0 + $0x3b0] sm:$0xff]  ;;  %v2567_v38 = vld [vmem:[%s4313_s3] sm:$0xff] }
 0x198   :  { %v307_v30 = vpack.c.bf16 %v146_v4, %v139_v11  ;;  %2124 = vmatpush.bf16.msrb.mxu3 %v2567_v38 }
 0x199   :  { %v3558_v53 = vadd.f32 %v1153_v40, %v1065_v41  ;;  %v978_v58 = vadd.f32 %v977_v44, %v889_v46 }
 0x19b   :  { %4317 = vst [vmem:[#allocation3_spill] sm:$0xff] %v3558_v53 }
 0x19e   :  { %v1066_v7 = vpop.f32.mrf.mxu2  ;;  %v1167_v20 = vpop.f32.mrf.mxu0 }
 0x19f   :  { %v3578_v15 = vadd.f32 %v1066_v7, %v978_v58  ;;  %v1256_v25 = vpop.f32.mrf.mxu1  ;;  %v1168_v31 = vadd.f32 %v1167_v20, %v3093_v36  ;;  %v151_v36 = vld [vmem:[%s4312_s0 + $0x410] sm:$0xff] }
 0x1a0   :  { %v312_v7 = vpack.c.bf16 %v158_v59, %v151_v36 }
 0x1a1   :  { %4318 = vst [vmem:[#allocation4_spill] sm:$0xff] %v3578_v15  ;;  %1206 = vmatmul.bf16.gmra.mxu0 %v305_v8  ;;  %v1257_v37 = vadd.f32 %v1256_v25, %v1168_v31  ;;  %v313_v8 = vpack.c.bf16 %v159_v62, %v152_v60 }
 0x1a2   :  { %1295 = vmatmul.bf16.gmra.mxu1 %v306_v13 }
 0x1a3   :  { %2446 = vmatmul.msk.bf16.gmra.mxu2 %vm753_vm0, %v307_v30 }
 0x1a6   :  { %v1345_v40 = vpop.f32.mrf.mxu2  ;;  %v1169_v42 = vpop.f32.mrf.mxu0 }
 0x1a7   :  { %v1346_v41 = vadd.f32 %v1345_v40, %v1257_v37  ;;  %v1258_v44 = vpop.f32.mrf.mxu1  ;;  %v1170_v58 = vadd.f32 %v1169_v42, %v3123_v57  ;;  %v153_v57 = vld [vmem:[%s4312_s0 + $0x420] sm:$0xff] }
 0x1a8   :  { %v314_v30 = vpack.c.bf16 %v160_v3, %v153_v57  ;;  %v165_v57 = vld [vmem:[%s4312_s0 + $0x480] sm:$0xff] }
 0x1a9   :  { %v2454_v46 = vmul.f32 -1.442695, %v1346_v41  ;;  %v1259_v11 = vadd.f32 %v1258_v44, %v1170_v58 }
 0x1ab   :  { %2577 = vpow2.f32 %v2454_v46 }
 0x1ae   :  { %v1347_v4 = vpop.f32.mrf.mxu2  ;;  %v1172_v20 = vpop.f32.mrf.mxu0 }
 0x1af   :  { %v1348_v13 = vadd.f32 %v1347_v4, %v1259_v11  ;;  %v1261_v25 = vpop.f32.mrf.mxu1  ;;  %v1173_v38 = vadd.f32 %v1172_v20, %v3126_v1  ;;  %v172_v11 = vld [vmem:[%s4312_s0 + $0x4b8] sm:$0xff]  ;;  %v173_v4 = vld [vmem:[%s4312_s0 + $0x4c0] sm:$0xff] }
 0x1b1   :  { %v2578_v31 = vpop.eup %2577  ;;  %v2455_v37 = vmul.f32 -1.442695, %v1348_v13  ;;  %1211 = vmatmul.bf16.gmra.mxu0 %v312_v7  ;;  %v1262_v41 = vadd.f32 %v1261_v25, %v1173_v38  ;;  %v167_v7 = vld [vmem:[%s4312_s0 + $0x490] sm:$0xff] }
 0x1b2   :  { %v3605_v40 = vadd.f32 1.0, %v2578_v31  ;;  %1300 = vmatmul.bf16.gmra.mxu1 %v313_v8  ;;  %v174_v8 = vld [vmem:[%s4312_s0 + $0x4c8] sm:$0xff] }
 0x1b3   :  { %2579 = vpow2.f32 %v2455_v37  ;;  %2447 = vmatmul.msk.bf16.gmra.mxu2 %vm753_vm0, %v314_v30  ;;  %v319_v30 = vpack.c.bf16 %v172_v11, %v165_v57 }
 0x1b4   :  { %2581 = vrcp.f32 %v3605_v40  ;;  %vm1558_vm2 = vweird.f32 %v3605_v40  ;;  %v1562_v11 = vand.u32 2147483647, %v3605_v40 }
 0x1b6   :  { %v1350_v42 = vpop.f32.mrf.mxu2  ;;  %v1174_v46 = vpop.f32.mrf.mxu0  ;;  %vm1563_vm6 = vcmp.eq.f32.partialorder %v1562_v11, 8.507059e+37 }
 0x1b7   :  { %v1351_v44 = vadd.f32 %v1350_v42, %v1262_v41  ;;  %v1263_v58 = vpop.f32.mrf.mxu1  ;;  %v1175_v60 = vadd.f32 %v1174_v46, %v3153_v22  ;;  %v166_v22 = vld [vmem:[%s4312_s0 + $0x488] sm:$0xff]  ;;  %v321_v42 = vpack.c.bf16 %v174_v8, %v167_v7 }
 0x1b8   :  { %v320_v31 = vpack.c.bf16 %v173_v4, %v166_v22  ;;  %v1564_v22 = vand.u32 2147483648, %v3605_v40 }
 0x1b9   :  { %v2580_v36 = vpop.eup %2579  ;;  %v2456_v59 = vmul.f32 -1.442695, %v1351_v44  ;;  %v1264_v20 = vadd.f32 %v1263_v58, %v1175_v60 }
 0x1ba   :  { %v3610_v62 = vpop.eup %2581  ;;  %v3612_v1 = vadd.f32 1.0, %v2580_v36 }
 0x1bb   :  { %v1554_v3 = vmul.f32 %v3610_v62, %v3605_v40  ;;  %2583 = vpow2.f32 %v2456_v59  ;;  %vm1559_vm1 = vweird.f32 %v3610_v62 }
 0x1bc   :  { %2585 = vrcp.f32 %v3612_v1  ;;  %v1579_v4 = vand.u32 2147483648, %v3612_v1  ;;  %vm3649_vm4 = vmor %vm1558_vm2, %vm1559_vm1  ;;  %vm1573_vm5 = vweird.f32 %v3612_v1 }
 0x1bd   :  { %v1555_v13 = vsub.f32 1.0, %v1554_v3 }
 0x1be   :  { %v1352_v25 = vpop.f32.mrf.mxu2  ;;  %v1177_v38 = vpop.f32.mrf.mxu0 }
 0x1bf   :  { %v1353_v37 = vadd.f32 %v1352_v25, %v1264_v20  ;;  %v1266_v41 = vpop.f32.mrf.mxu1  ;;  %v1178_v36 = vadd.f32 %v1177_v38, %v3162_v32  ;;  %v1556_v59 = vmul.f32 %v3610_v62, %v1555_v13  ;;  %v1577_v25 = vand.u32 2147483647, %v3612_v1 }
 0x1c1   :  { %v2584_v44 = vpop.eup %2583  ;;  %v2457_v46 = vmul.f32 -1.442695, %v1353_v37  ;;  %1216 = vmatmul.bf16.gmra.mxu0 %v319_v30  ;;  %v1267_v57 = vadd.f32 %v1266_v41, %v1178_v36  ;;  %v1557_v3 = vadd.f32 %v3610_v62, %v1556_v59  ;;  %v1580_v36 = vor.u32 1.1754944e-38, %v1579_v4 }
 0x1c2   :  { %v2586_v15 = vpop.eup %2585  ;;  %v3637_v53 = vadd.f32 1.0, %v2584_v44  ;;  %1305 = vmatmul.bf16.gmra.mxu1 %v320_v31  ;;  %vm1578_vm8 = vcmp.eq.f32.partialorder %v1577_v25, 8.507059e+37 }
 0x1c3   :  { %v1569_v58 = vmul.f32 %v2586_v15, %v3612_v1  ;;  %2587 = vpow2.f32 %v2457_v46  ;;  %2448 = vmatmul.msk.bf16.gmra.mxu2 %vm753_vm0, %v321_v42  ;;  %vm1574_vm3 = vweird.f32 %v2586_v15  ;;  %v1561_v40 = vsel %vm3649_vm4, %v3610_v62, %v1557_v3  ;;  %v179_v1 = vld [vmem:[%s4312_s0 + $0x4f0] sm:$0xff]  ;;  %v186_v62 = vld [vmem:[%s4312_s0 + $0x528] sm:$0xff] }
 0x1c4   :  { %2589 = vrcp.f32 %v3637_v53  ;;  %v1565_v46 = vor.u32 1.1754944e-38, %v1564_v22  ;;  %vm1575_vm7 = vmor %vm1573_vm5, %vm1574_vm3  ;;  %vm1588_vm10 = vweird.f32 %v3637_v53 }
 0x1c5   :  { %v1570_v60 = vsub.f32 1.0, %v1569_v58  ;;  %v180_v58 = vld [vmem:[%s4312_s0 + $0x4f8] sm:$0xff] }
 0x1c6   :  { %v1355_v32 = vpop.f32.mrf.mxu2  ;;  %v1179_v8 = vpop.f32.mrf.mxu0 }
 0x1c7   :  { %v1356_v7 = vadd.f32 %v1355_v32, %v1267_v57  ;;  %v1268_v13 = vpop.f32.mrf.mxu1  ;;  %v1571_v20 = vmul.f32 %v2586_v15, %v1570_v60  ;;  %v1180_v38 = vadd.f32 %v1179_v8, %v3192_v54  ;;  %v187_v60 = vld [vmem:[%s4312_s0 + $0x530] sm:$0xff]  ;;  %v1566_v57 = vsel %vm1563_vm6, %v1565_v46, %v1561_v40  ;;  %v188_v32 = vld [vmem:[%s4312_s0 + $0x538] sm:$0xff] }
 0x1c8   :  { %v326_v8 = vpack.c.bf16 %v186_v62, %v179_v1  ;;  %v1592_v62 = vand.u32 2147483647, %v3637_v53 }
 0x1c9   :  { %v2588_v31 = vpop.eup %2587  ;;  %v2458_v37 = vmul.f32 -1.442695, %v1356_v7  ;;  %v1572_v41 = vadd.f32 %v2586_v15, %v1571_v20  ;;  %v1269_v11 = vadd.f32 %v1268_v13, %v1180_v38  ;;  %v327_v20 = vpack.c.bf16 %v187_v60, %v180_v58 }
 0x1ca   :  { %v3658_v42 = vpop.eup %2589  ;;  %v3660_v44 = vadd.f32 1.0, %v2588_v31  ;;  %v1594_v58 = vand.u32 2147483648, %v3637_v53  ;;  %vm1593_vm14 = vcmp.eq.f32.partialorder %v1592_v62, 8.507059e+37 }
 0x1cb   :  { %v1584_v54 = vmul.f32 %v3658_v42, %v3637_v53  ;;  %2591 = vpow2.f32 %v2458_v37  ;;  %v1576_v59 = vsel %vm1575_vm7, %v2586_v15, %v1572_v41  ;;  %v181_v15 = vld [vmem:[%s4312_s0 + $0x500] sm:$0xff]  ;;  %vm1589_vm9 = vweird.f32 %v3658_v42 }
 0x1cc   :  { %2593 = vrcp.f32 %v3660_v44  ;;  %v1581_v3 = vsel %vm1578_vm8, %v1580_v36, %v1576_v59  ;;  %v328_v37 = vpack.c.bf16 %v188_v32, %v181_v15  ;;  %v1609_v60 = vand.u32 2147483648, %v3660_v44  ;;  %vm3697_vm12 = vmor %vm1588_vm10, %vm1589_vm9 }
 0x1cd   :  { %v2033_v22 = vpack.c.bf16 %v1581_v3, %v1566_v57  ;;  %v1585_v4 = vsub.f32 1.0, %v1584_v54  ;;  %vm1603_vm13 = vweird.f32 %v3660_v44 }
 0x1ce   :  { %v1357_v7 = vpop.f32.mrf.mxu2  ;;  %v1182_v30 = vpop.f32.mrf.mxu0 }
 0x1cf   :  { %v1358_v25 = vadd.f32 %v1357_v7, %v1269_v11  ;;  %2125 = vmatmul.bf16.vlgmr.msrb.gmra.mxu3 %v2033_v22  ;;  %v1271_v31 = vpop.f32.mrf.mxu1  ;;  %v1183_v46 = vadd.f32 %v1182_v30, %v3195_v63  ;;  %v1586_v36 = vmul.f32 %v3658_v42, %v1585_v4  ;;  %v1607_v11 = vand.u32 2147483647, %v3660_v44 }
 0x1d1   :  { %v2592_v40 = vpop.eup %2591  ;;  %v2459_v41 = vmul.f32 -1.442695, %v1358_v25  ;;  %1221 = vmatmul.bf16.gmra.mxu0 %v326_v8  ;;  %v1272_v38 = vadd.f32 %v1271_v31, %v1183_v46  ;;  %v1587_v1 = vadd.f32 %v3658_v42, %v1586_v36  ;;  %v1595_v31 = vor.u32 1.1754944e-38, %v1594_v58  ;;  %v201_v46 = vld [vmem:[%s4312_s0 + $0x5a0] sm:$0xff] }
 0x1d2   :  { %v2594_v59 = vpop.eup %2593  ;;  %v3685_v12 = vadd.f32 1.0, %v2592_v40  ;;  %1310 = vmatmul.bf16.gmra.mxu1 %v327_v20  ;;  %vm1608_vm1 = vcmp.eq.f32.partialorder %v1607_v11, 8.507059e+37 }
 0x1d3   :  { %2595 = vpow2.f32 %v2459_v41  ;;  %2449 = vmatmul.msk.bf16.gmra.mxu2 %vm753_vm0, %v328_v37  ;;  %v1599_v13 = vmul.f32 %v2594_v59, %v3660_v44  ;;  %vm1604_vm11 = vweird.f32 %v2594_v59  ;;  %v1591_v53 = vsel %vm3697_vm12, %v3658_v42, %v1587_v1  ;;  %v193_v44 = vld [vmem:[%s4312_s0 + $0x560] sm:$0xff]  ;;  %v200_v42 = vld [vmem:[%s4312_s0 + $0x598] sm:$0xff]  ;;  %v194_v41 = vld [vmem:[%s4312_s0 + $0x568] sm:$0xff] }
 0x1d4   :  { %2597 = vrcp.f32 %v3685_v12  ;;  %vm1605_vm15 = vmor %vm1603_vm13, %vm1604_vm11  ;;  %v1610_v37 = vor.u32 1.1754944e-38, %v1609_v60  ;;  %v1596_v36 = vsel %vm1593_vm14, %v1595_v31, %v1591_v53  ;;  %v333_v58 = vpack.c.bf16 %v200_v42, %v193_v44 }
 0x1d5   :  { %v1600_v63 = vsub.f32 1.0, %v1599_v13  ;;  %v334_v60 = vpack.c.bf16 %v201_v46, %v194_v41  ;;  %vm1618_vm3 = vweird.f32 %v3685_v12  ;;  %v1624_v42 = vand.u32 2147483648, %v3685_v12 }
 0x1d6   :  { %v1360_v54 = vpop.f32.mrf.mxu2  ;;  %v1184_v3 = vpop.f32.mrf.mxu0 }
 0x1d7   :  { %v1361_v57 = vadd.f32 %v1360_v54, %v1272_v38  ;;  %v1273_v15 = vpop.f32.mrf.mxu1  ;;  %v1601_v32 = vmul.f32 %v2594_v59, %v1600_v63  ;;  %v1185_v8 = vadd.f32 %v1184_v3, %v3222_v21  ;;  %v202_v38 = vld [vmem:[%s4312_s0 + $0x5a8] sm:$0xff] }
 0x1d9   :  { %v2596_v4 = vpop.eup %2595  ;;  %v2460_v7 = vmul.f32 -1.442695, %v1361_v57  ;;  %v1602_v20 = vadd.f32 %v2594_v59, %v1601_v32  ;;  %v1274_v1 = vadd.f32 %v1273_v15, %v1185_v8  ;;  %v1101_v8 = vadd.f32 %v3257_v45, %v3259_v48 }
 0x1da   :  { %v3706_v25 = vpop.eup %2597  ;;  %v3708_v30 = vadd.f32 1.0, %v2596_v4 }
 0x1db   :  { %v1614_v21 = vmul.f32 %v3706_v25, %v3685_v12  ;;  %2599 = vpow2.f32 %v2460_v7  ;;  %v1606_v40 = vsel %vm1605_vm15, %v2594_v59, %v1602_v20  ;;  %v195_v59 = vld [vmem:[%s4312_s0 + $0x570] sm:$0xff]  ;;  %vm1619_vm2 = vweird.f32 %v3706_v25 }
 0x1dc   :  { %2601 = vrcp.f32 %v3708_v30  ;;  %v1611_v13 = vsel %vm1608_vm1, %v1610_v37, %v1606_v40  ;;  %v335_v11 = vpack.c.bf16 %v202_v38, %v195_v59  ;;  %v1622_v40 = vand.u32 2147483647, %v3685_v12  ;;  %vm3747_vm5 = vmor %vm1618_vm3, %vm1619_vm2 }
 0x1dd   :  { %v2034_v63 = vpack.c.bf16 %v1611_v13, %v1596_v36  ;;  %v1615_v54 = vsub.f32 1.0, %v1614_v21  ;;  %v1639_v41 = vand.u32 2147483648, %v3708_v30  ;;  %v1637_v13 = vand.u32 2147483647, %v3708_v30 }
 0x1de   :  { %v1362_v62 = vpop.f32.mrf.mxu2  ;;  %v1187_v3 = vpop.f32.mrf.mxu0  ;;  %vm1633_vm6 = vweird.f32 %v3708_v30  ;;  %vm1623_vm7 = vcmp.eq.f32.partialorder %v1622_v40, 8.507059e+37 }
 0x1df   :  { %v1363_v57 = vadd.f32 %v1362_v62, %v1274_v1  ;;  %2130 = vmatmul.bf16.gmra.mxu3 %v2034_v63  ;;  %v1276_v32 = vpop.f32.mrf.mxu1  ;;  %v1188_v7 = vadd.f32 %v1187_v3, %v3231_v33  ;;  %v1616_v53 = vmul.f32 %v3706_v25, %v1615_v54  ;;  %vm1638_vm9 = vcmp.eq.f32.partialorder %v1637_v13, 8.507059e+37 }
 0x1e1   :  { %v2600_v22 = vpop.eup %2599  ;;  %v2461_v4 = vmul.f32 -1.442695, %v1363_v57  ;;  %1226 = vmatmul.bf16.gmra.mxu0 %v333_v58  ;;  %v1277_v37 = vadd.f32 %v1276_v32, %v1188_v7  ;;  %v1617_v33 = vadd.f32 %v3706_v25, %v1616_v53  ;;  %v1640_v57 = vor.u32 1.1754944e-38, %v1639_v41  ;;  %v209_v53 = vld [vmem:[%s4312_s0 + $0x5e0] sm:$0xff] }
 0x1e2   :  { %v2602_v20 = vpop.eup %2601  ;;  %v3733_v31 = vadd.f32 1.0, %v2600_v22  ;;  %1315 = vmatmul.bf16.gmra.mxu1 %v334_v60  ;;  %v1625_v60 = vor.u32 1.1754944e-38, %v1624_v42  ;;  %v215_v22 = vld [vmem:[%s4312_s0 + $0x610] sm:$0xff] }
 0x1e3   :  { %2603 = vpow2.f32 %v2461_v4  ;;  %2450 = vmatmul.msk.bf16.gmra.mxu2 %vm753_vm0, %v335_v11  ;;  %v1629_v15 = vmul.f32 %v2602_v20, %v3708_v30  ;;  %vm1634_vm4 = vweird.f32 %v2602_v20  ;;  %v1621_v12 = vsel %vm3747_vm5, %v3706_v25, %v1617_v33  ;;  %v207_v30 = vld [vmem:[%s4312_s0 + $0x5d0] sm:$0xff]  ;;  %v214_v25 = vld [vmem:[%s4312_s0 + $0x608] sm:$0xff]  ;;  %v208_v11 = vld [vmem:[%s4312_s0 + $0x5d8] sm:$0xff] }
 0x1e4   :  { %2605 = vrcp.f32 %v3733_v31  ;;  %vm1635_vm8 = vmor %vm1633_vm6, %vm1634_vm4  ;;  %v1626_v4 = vsel %vm1623_vm7, %v1625_v60, %v1621_v12  ;;  %vm1648_vm11 = vweird.f32 %v3733_v31 }
 0x1e5   :  { %v1630_v44 = vsub.f32 1.0, %v1629_v15 }
 0x1e6   :  { %v1365_v21 = vpop.f32.mrf.mxu2  ;;  %v1189_v36 = vpop.f32.mrf.mxu0 }
 0x1e7   :  { %v1366_v46 = vadd.f32 %v1365_v21, %v1277_v37  ;;  %v1278_v45 = vpop.f32.mrf.mxu1  ;;  %v1631_v48 = vmul.f32 %v2602_v20, %v1630_v44  ;;  %v1190_v63 = vadd.f32 %v1189_v36, %v1101_v8  ;;  %v340_v44 = vpack.c.bf16 %v214_v25, %v207_v30 }
 0x1e8   :  { %v341_v21 = vpack.c.bf16 %v215_v22, %v208_v11  ;;  %v1654_v30 = vand.u32 2147483648, %v3733_v31  ;;  %v1111_v22 = vadd.f32 %v3324_v47, %v3326_v51 }
 0x1e9   :  { %v2604_v38 = vpop.eup %2603  ;;  %v2462_v1 = vmul.f32 -1.442695, %v1366_v46  ;;  %v1632_v54 = vadd.f32 %v2602_v20, %v1631_v48  ;;  %v1279_v15 = vadd.f32 %v1278_v45, %v1190_v63  ;;  %v1106_v63 = vadd.f32 %v3292_v14, %v3294_v17 }
 0x1ea   :  { %v3755_v62 = vpop.eup %2605  ;;  %v3757_v58 = vadd.f32 1.0, %v2604_v38 }
 0x1eb   :  { %v1644_v3 = vmul.f32 %v3755_v62, %v3733_v31  ;;  %2607 = vpow2.f32 %v2462_v1  ;;  %v1636_v32 = vsel %vm1635_vm8, %v2602_v20, %v1632_v54  ;;  %v216_v20 = vld [vmem:[%s4312_s0 + $0x618] sm:$0xff]  ;;  %vm1649_vm10 = vweird.f32 %v3755_v62 }
 0x1ec   :  { %2609 = vrcp.f32 %v3757_v58  ;;  %v1641_v7 = vsel %vm1638_vm9, %v1640_v57, %v1636_v32  ;;  %v342_v46 = vpack.c.bf16 %v216_v20, %v209_v53  ;;  %v1652_v57 = vand.u32 2147483647, %v3733_v31  ;;  %vm3796_vm13 = vmor %vm1648_vm11, %vm1649_vm10 }
 0x1ed   :  { %v2035_v8 = vpack.c.bf16 %v1641_v7, %v1626_v4  ;;  %v1645_v37 = vsub.f32 1.0, %v1644_v3  ;;  %v1669_v3 = vand.u32 2147483648, %v3757_v58  ;;  %v1667_v11 = vand.u32 2147483647, %v3757_v58 }
 0x1ee   :  { %v1367_v33 = vpop.f32.mrf.mxu2  ;;  %v1192_v42 = vpop.f32.mrf.mxu0  ;;  %vm1663_vm14 = vweird.f32 %v3757_v58  ;;  %vm1653_vm15 = vcmp.eq.f32.partialorder %v1652_v57, 8.507059e+37 }
 0x1ef   :  { %v1368_v40 = vadd.f32 %v1367_v33, %v1279_v15  ;;  %2135 = vmatmul.bf16.gmra.mxu3 %v2035_v8  ;;  %v1281_v41 = vpop.f32.mrf.mxu1  ;;  %v1193_v13 = vadd.f32 %v1192_v42, %v3266_v2  ;;  %v1646_v59 = vmul.f32 %v3755_v62, %v1645_v37  ;;  %v1655_v37 = vor.u32 1.1754944e-38, %v1654_v30  ;;  %v229_v42 = vld [vmem:[%s4312_s0 + $0x680] sm:$0xff] }
 0x1f0   :  { %v1670_v33 = vor.u32 1.1754944e-38, %v1669_v3  ;;  %vm1668_vm2 = vcmp.eq.f32.partialorder %v1667_v11, 8.507059e+37 }
 0x1f1   :  { %v2608_v36 = vpop.eup %2607  ;;  %v2463_v48 = vmul.f32 -1.442695, %v1368_v40  ;;  %1231 = vmatmul.bf16.gmra.mxu0 %v340_v44  ;;  %v1282_v12 = vadd.f32 %v1281_v41, %v1193_v13  ;;  %v1647_v2 = vadd.f32 %v3755_v62, %v1646_v59  ;;  %v222_v40 = vld [vmem:[%s4312_s0 + $0x648] sm:$0xff] }
 0x1f2   :  { %v2610_v38 = vpop.eup %2609  ;;  %v3782_v1 = vadd.f32 1.0, %v2608_v36  ;;  %1320 = vmatmul.bf16.gmra.mxu1 %v341_v21  ;;  %v223_v36 = vld [vmem:[%s4312_s0 + $0x650] sm:$0xff] }
 0x1f3   :  { %2611 = vpow2.f32 %v2463_v48  ;;  %2451 = vmatmul.msk.bf16.gmra.mxu2 %vm753_vm0, %v342_v46  ;;  %v1659_v45 = vmul.f32 %v2610_v38, %v3757_v58  ;;  %vm1664_vm12 = vweird.f32 %v2610_v38  ;;  %v1651_v31 = vsel %vm3796_vm13, %v3755_v62, %v1647_v2  ;;  %v221_v58 = vld [vmem:[%s4312_s0 + $0x640] sm:$0xff]  ;;  %v228_v62 = vld [vmem:[%s4312_s0 + $0x678] sm:$0xff]  ;;  %v230_v48 = vld [vmem:[%s4312_s0 + $0x688] sm:$0xff] }
 0x1f4   :  { %2613 = vrcp.f32 %v3782_v1  ;;  %vm1665_vm1 = vmor %vm1663_vm14, %vm1664_vm12  ;;  %v1656_v41 = vsel %vm1653_vm15, %v1655_v37, %v1651_v31  ;;  %v349_v57 = vpack.c.bf16 %v230_v48, %v223_v36  ;;  %vm1678_vm4 = vweird.f32 %v3782_v1 }
 0x1f5   :  { %v1660_v54 = vsub.f32 1.0, %v1659_v45  ;;  %v1682_v31 = vand.u32 2147483647, %v3782_v1 }
 0x1f6   :  { %v1370_v60 = vpop.f32.mrf.mxu2  ;;  %v1194_v25 = vpop.f32.mrf.mxu0 }
 0x1f7   :  { %v1371_v32 = vadd.f32 %v1370_v60, %v1282_v12  ;;  %v1283_v14 = vpop.f32.mrf.mxu1  ;;  %v1661_v17 = vmul.f32 %v2610_v38, %v1660_v54  ;;  %v1195_v53 = vadd.f32 %v1194_v25, %v1106_v63  ;;  %v347_v63 = vpack.c.bf16 %v228_v62, %v221_v58 }
 0x1f8   :  { %v348_v12 = vpack.c.bf16 %v229_v42, %v222_v40  ;;  %vm1683_vm8 = vcmp.eq.f32.partialorder %v1682_v31, 8.507059e+37 }
 0x1f9   :  { %v2612_v4 = vpop.eup %2611  ;;  %v2464_v7 = vmul.f32 -1.442695, %v1371_v32  ;;  %v1662_v20 = vadd.f32 %v2610_v38, %v1661_v17  ;;  %v1284_v13 = vadd.f32 %v1283_v14, %v1195_v53 }
 0x1fa   :  { %v3804_v15 = vpop.eup %2613  ;;  %v3806_v8 = vadd.f32 1.0, %v2612_v4 }
 0x1fb   :  { %v1674_v44 = vmul.f32 %v3804_v15, %v3782_v1  ;;  %2615 = vpow2.f32 %v2464_v7  ;;  %v1666_v21 = vsel %vm1665_vm1, %v2610_v38, %v1662_v20  ;;  %vm1679_vm3 = vweird.f32 %v3804_v15 }
 0x1fc   :  { %2617 = vrcp.f32 %v3806_v8  ;;  %v1671_v46 = vsel %vm1668_vm2, %v1670_v33, %v1666_v21  ;;  %v1684_v20 = vand.u32 2147483648, %v3782_v1  ;;  %v1699_v37 = vand.u32 2147483648, %v3806_v8  ;;  %vm3845_vm6 = vmor %vm1678_vm4, %vm1679_vm3 }
 0x1fd   :  { %v2036_v59 = vpack.c.bf16 %v1671_v46, %v1656_v41  ;;  %v1675_v38 = vsub.f32 1.0, %v1674_v44  ;;  %v1697_v44 = vand.u32 2147483647, %v3806_v8  ;;  %vm1693_vm7 = vweird.f32 %v3806_v8 }
 0x1fe   :  { %v1372_v45 = vpop.f32.mrf.mxu2  ;;  %v1197_v54 = vpop.f32.mrf.mxu0  ;;  %v1685_v48 = vor.u32 1.1754944e-38, %v1684_v20 }
 0x1ff   :  { %v1373_v2 = vadd.f32 %v1372_v45, %v1284_v13  ;;  %2140 = vmatmul.bf16.gmra.mxu3 %v2036_v59  ;;  %v1286_v60 = vpop.f32.mrf.mxu1  ;;  %v1198_v32 = vadd.f32 %v1197_v54, %v3298_v34  ;;  %v1676_v25 = vmul.f32 %v3804_v15, %v1675_v38  ;;  %v1700_v13 = vor.u32 1.1754944e-38, %v1699_v37  ;;  %v236_v45 = vld [vmem:[%s4312_s0 + $0x6b8] sm:$0xff]  ;;  %v237_v54 = vld [vmem:[%s4312_s0 + $0x6c0] sm:$0xff] }
 0x200   :  { %vm1698_vm10 = vcmp.eq.f32.partialorder %v1697_v44, 8.507059e+37 }
 0x201   :  { %v2616_v30 = vpop.eup %2615  ;;  %v2465_v3 = vmul.f32 -1.442695, %v1373_v2  ;;  %1236 = vmatmul.bf16.gmra.mxu0 %v347_v63  ;;  %v1287_v4 = vadd.f32 %v1286_v60, %v1198_v32  ;;  %v1677_v34 = vadd.f32 %v3804_v15, %v1676_v25  ;;  %v243_v63 = vld [vmem:[%s4312_s0 + $0x6f0] sm:$0xff]  ;;  %v244_v60 = vld [vmem:[%s4312_s0 + $0x6f8] sm:$0xff] }
 0x202   :  { %v2618_v17 = vpop.eup %2617  ;;  %v3831_v11 = vadd.f32 1.0, %v2616_v30  ;;  %1325 = vmatmul.bf16.gmra.mxu1 %v348_v12 }
 0x203   :  { %v1689_v14 = vmul.f32 %v2618_v17, %v3806_v8  ;;  %2619 = vpow2.f32 %v2465_v3  ;;  %2452 = vmatmul.msk.bf16.gmra.mxu2 %vm753_vm0, %v349_v57  ;;  %vm1694_vm5 = vweird.f32 %v2618_v17  ;;  %v1681_v1 = vsel %vm3845_vm6, %v3804_v15, %v1677_v34  ;;  %v235_v8 = vld [vmem:[%s4312_s0 + $0x6b0] sm:$0xff]  ;;  %v242_v15 = vld [vmem:[%s4312_s0 + $0x6e8] sm:$0xff] }
 0x204   :  { %2621 = vrcp.f32 %v3831_v11  ;;  %vm1695_vm9 = vmor %vm1693_vm7, %vm1694_vm5  ;;  %v1686_v12 = vsel %vm1683_vm8, %v1685_v48, %v1681_v1  ;;  %v354_v25 = vpack.c.bf16 %v242_v15, %v235_v8  ;;  %v356_v34 = vpack.c.bf16 %v244_v60, %v237_v54 }
 0x205   :  { %v1690_v7 = vsub.f32 1.0, %v1689_v14  ;;  %vm1708_vm12 = vweird.f32 %v3831_v11 }
 0x206   :  { %v1375_v53 = vpop.f32.mrf.mxu2  ;;  %v1199_v58 = vpop.f32.mrf.mxu0 }
 0x207   :  { %v1376_v33 = vadd.f32 %v1375_v53, %v1287_v4  ;;  %v1288_v47 = vpop.f32.mrf.mxu1  ;;  %v1691_v51 = vmul.f32 %v2618_v17, %v1690_v7  ;;  %v1200_v42 = vadd.f32 %v1199_v58, %v1111_v22 }
 0x209   :  { %v2620_v62 = vpop.eup %2619  ;;  %v2466_v40 = vmul.f32 -1.442695, %v1376_v33  ;;  %v1692_v41 = vadd.f32 %v2618_v17, %v1691_v51  ;;  %v1289_v57 = vadd.f32 %v1288_v47, %v1200_v42  ;;  %v1116_v47 = vadd.f32 %v3353_v18, %v3355_v23 }
 0x20a   :  { %v3853_v46 = vpop.eup %2621  ;;  %v3855_v36 = vadd.f32 1.0, %v2620_v62  ;;  %v1712_v62 = vand.u32 2147483647, %v3831_v11 }
 0x20b   :  { %v1704_v59 = vmul.f32 %v3853_v46, %v3831_v11  ;;  %2623 = vpow2.f32 %v2466_v40  ;;  %v1696_v38 = vsel %vm1695_vm9, %v2618_v17, %v1692_v41  ;;  %v355_v17 = vpack.c.bf16 %v243_v63, %v236_v45 }
 0x20c   :  { %2625 = vrcp.f32 %v3855_v36  ;;  %v1701_v2 = vsel %vm1698_vm10, %v1700_v13, %v1696_v38  ;;  %vm1709_vm11 = vweird.f32 %v3853_v46  ;;  %v1714_v40 = vand.u32 2147483648, %v3831_v11 }
 0x20d   :  { %v2037_v30 = vpack.c.bf16 %v1701_v2, %v1686_v12  ;;  %v1705_v3 = vsub.f32 1.0, %v1704_v59  ;;  %v1729_v42 = vand.u32 2147483648, %v3855_v36  ;;  %v1727_v48 = vand.u32 2147483647, %v3855_v36  ;;  %vm3894_vm13 = vmor %vm1708_vm12, %vm1709_vm11 }
 0x20e   :  { %v1377_v32 = vpop.f32.mrf.mxu2  ;;  %v1202_v22 = vpop.f32.mrf.mxu0  ;;  %vm1723_vm14 = vweird.f32 %v3855_v36  ;;  %vm1713_vm15 = vcmp.eq.f32.partialorder %v1712_v62, 8.507059e+37  ;;  %v1715_v12 = vor.u32 1.1754944e-38, %v1714_v40 }
 0x20f   :  { %v1378_v14 = vadd.f32 %v1377_v32, %v1289_v57  ;;  %2145 = vmatmul.bf16.gmra.mxu3 %v2037_v30  ;;  %v1291_v4 = vpop.f32.mrf.mxu1  ;;  %v1203_v31 = vadd.f32 %v1202_v22, %v3333_v6  ;;  %v1706_v20 = vmul.f32 %v3853_v46, %v1705_v3  ;;  %v1730_v2 = vor.u32 1.1754944e-38, %v1729_v42 }
 0x210   :  { %vm1728_vm2 = vcmp.eq.f32.partialorder %v1727_v48, 8.507059e+37 }
 0x211   :  { %v2624_v7 = vpop.eup %2623  ;;  %v2467_v53 = vmul.f32 -1.442695, %v1378_v14  ;;  %1241 = vmatmul.bf16.gmra.mxu0 %v354_v25  ;;  %v1292_v51 = vadd.f32 %v1291_v4, %v1203_v31  ;;  %v1707_v6 = vadd.f32 %v3853_v46, %v1706_v20 }
 0x212   :  { %v2626_v37 = vpop.eup %2625  ;;  %v3880_v33 = vadd.f32 1.0, %v2624_v7  ;;  %1330 = vmatmul.bf16.gmra.mxu1 %v355_v17 }
 0x213   :  { %v1719_v58 = vmul.f32 %v2626_v37, %v3855_v36  ;;  %2627 = vpow2.f32 %v2467_v53  ;;  %2453 = vmatmul.msk.bf16.gmra.mxu2 %vm753_vm0, %v356_v34  ;;  %vm1724_vm0 = vweird.f32 %v2626_v37  ;;  %v1711_v11 = vsel %vm3894_vm13, %v3853_v46, %v1707_v6 }
 0x214   :  { %2629 = vrcp.f32 %v3880_v33  ;;  %vm1725_vm1 = vmor %vm1723_vm14, %vm1724_vm0  ;;  %v1716_v60 = vsel %vm1713_vm15, %v1715_v12, %v1711_v11  ;;  %vm1738_vm4 = vweird.f32 %v3880_v33 }
 0x215   :  { %v1720_v44 = vsub.f32 1.0, %v1719_v58 }
 0x216   :  { %v1380_v21 = vpop.f32.mrf.mxu2  ;;  %v1204_v41 = vpop.f32.mrf.mxu0 }
 0x217   :  { %v1381_v1 = vadd.f32 %v1380_v21, %v1292_v51  ;;  %v1293_v18 = vpop.f32.mrf.mxu1  ;;  %v1721_v23 = vmul.f32 %v2626_v37, %v1720_v44  ;;  %v1205_v38 = vadd.f32 %v1204_v41, %v1116_v47  ;;  %v1744_v44 = vand.u32 2147483648, %v3880_v33 }
 0x219   :  { %v2628_v8 = vpop.eup %2627  ;;  %v2468_v59 = vmul.f32 -1.442695, %v1381_v1  ;;  %v1722_v15 = vadd.f32 %v2626_v37, %v1721_v23  ;;  %v1294_v30 = vadd.f32 %v1293_v18, %v1205_v38 }
 0x21a   :  { %v3902_v45 = vpop.eup %2629  ;;  %v1534_v63 = vadd.f32 1.0, %v2628_v8 }
 0x21b   :  { %v1734_v54 = vmul.f32 %v3902_v45, %v3880_v33  ;;  %2631 = vpow2.f32 %v2468_v59  ;;  %v1726_v36 = vsel %vm1725_vm1, %v2626_v37, %v1722_v15  ;;  %v1121_v37 = vadd.f32 %v3380_v52, %v3382_v56 }
 0x21c   :  { %2633 = vrcp.f32 %v1534_v63  ;;  %v1731_v57 = vsel %vm1728_vm2, %v1730_v2, %v1726_v36  ;;  %vm1739_vm3 = vweird.f32 %v3902_v45  ;;  %v1759_v21 = vand.u32 2147483648, %v1534_v63 }
 0x21d   :  { %v2038_v3 = vpack.c.bf16 %v1731_v57, %v1716_v60  ;;  %v1735_v46 = vsub.f32 1.0, %v1734_v54  ;;  %v1757_v56 = vand.u32 2147483647, %v1534_v63  ;;  %vm3918_vm6 = vmor %vm1738_vm4, %vm1739_vm3  ;;  %vm1753_vm7 = vweird.f32 %v1534_v63 }
 0x21e   :  { %v1382_v32 = vpop.f32.mrf.mxu2  ;;  %v1207_v17 = vpop.f32.mrf.mxu0  ;;  %v1745_v59 = vor.u32 1.1754944e-38, %v1744_v44  ;;  %v1760_v38 = vor.u32 1.1754944e-38, %v1759_v21 }
 0x21f   :  { %v1383_v25 = vadd.f32 %v1382_v32, %v1294_v30  ;;  %2150 = vmatmul.bf16.gmra.mxu3 %v2038_v3  ;;  %v1296_v14 = vpop.f32.mrf.mxu1  ;;  %v1208_v34 = vadd.f32 %v1207_v17, %v3360_v39  ;;  %v1736_v7 = vmul.f32 %v3902_v45, %v1735_v46  ;;  %v1742_v39 = vand.u32 2147483647, %v3880_v33 }
 0x220   :  { %vm1758_vm10 = vcmp.eq.f32.partialorder %v1757_v56, 8.507059e+37 }
 0x221   :  { %v2632_v22 = vpop.eup %2631  ;;  %v2469_v4 = vmul.f32 -1.442695, %v1383_v25  ;;  %v1297_v58 = vadd.f32 %v1296_v14, %v1208_v34  ;;  %v1737_v47 = vadd.f32 %v3902_v45, %v1736_v7  ;;  %vm1743_vm8 = vcmp.eq.f32.partialorder %v1742_v39, 8.507059e+37 }
 0x222   :  { %v2634_v53 = vpop.eup %2633  ;;  %v3908_v31 = vadd.f32 1.0, %v2632_v22 }
 0x223   :  { %v1749_v20 = vmul.f32 %v2634_v53, %v1534_v63  ;;  %2635 = vpow2.f32 %v2469_v4  ;;  %vm1754_vm5 = vweird.f32 %v2634_v53  ;;  %v1741_v48 = vsel %vm3918_vm6, %v3902_v45, %v1737_v47 }
 0x224   :  { %2637 = vrcp.f32 %v3908_v31  ;;  %vm1755_vm9 = vmor %vm1753_vm7, %vm1754_vm5  ;;  %v1746_v63 = vsel %vm1743_vm8, %v1745_v59, %v1741_v48  ;;  %v1126_v4 = vadd.f32 %v3410_v26, %v3412_v29  ;;  %vm1768_vm12 = vweird.f32 %v3908_v31 }
 0x225   :  { %v1750_v51 = vsub.f32 1.0, %v1749_v20 }
 0x226   :  { %v1385_v6 = vpop.f32.mrf.mxu2  ;;  %v1209_v40 = vpop.f32.mrf.mxu0 }
 0x227   :  { %v1386_v62 = vadd.f32 %v1385_v6, %v1297_v58  ;;  %v1298_v42 = vpop.f32.mrf.mxu1  ;;  %v1751_v52 = vmul.f32 %v2634_v53, %v1750_v51  ;;  %v1210_v23 = vadd.f32 %v1209_v40, %v1121_v37  ;;  %v1774_v37 = vand.u32 2147483648, %v3908_v31 }
 0x229   :  { %v2636_v41 = vpop.eup %2635  ;;  %v2470_v18 = vmul.f32 -1.442695, %v1386_v62  ;;  %v1752_v33 = vadd.f32 %v2634_v53, %v1751_v52  ;;  %v1299_v2 = vadd.f32 %v1298_v42, %v1210_v23  ;;  %v1775_v56 = vor.u32 1.1754944e-38, %v1774_v37 }
 0x22a   :  { %v3925_v13 = vpop.eup %2637  ;;  %v1536_v8 = vadd.f32 1.0, %v2636_v41 }
 0x22b   :  { %v1764_v11 = vmul.f32 %v3925_v13, %v3908_v31  ;;  %2639 = vpow2.f32 %v2470_v18  ;;  %v1756_v15 = vsel %vm1755_vm9, %v2634_v53, %v1752_v33  ;;  %vm1769_vm11 = vweird.f32 %v3925_v13 }
 0x22c   :  { %2641 = vrcp.f32 %v1536_v8  ;;  %v1761_v12 = vsel %vm1758_vm10, %v1760_v38, %v1756_v15  ;;  %v1789_v58 = vand.u32 2147483648, %v1536_v8  ;;  %v1787_v29 = vand.u32 2147483647, %v1536_v8  ;;  %vm3941_vm13 = vmor %vm1768_vm12, %vm1769_vm11 }
 0x22d   :  { %v2039_v54 = vpack.c.bf16 %v1761_v12, %v1746_v63  ;;  %v1765_v45 = vsub.f32 1.0, %v1764_v11  ;;  %vm1783_vm14 = vweird.f32 %v1536_v8 }
 0x22e   :  { %v1387_v36 = vpop.f32.mrf.mxu2  ;;  %v1212_v57 = vpop.f32.mrf.mxu0  ;;  %v1790_v1 = vor.u32 1.1754944e-38, %v1789_v58  ;;  %vm1788_vm2 = vcmp.eq.f32.partialorder %v1787_v29, 8.507059e+37 }
 0x22f   :  { %v1388_v60 = vadd.f32 %v1387_v36, %v1299_v2  ;;  %2155 = vmatmul.bf16.gmra.mxu3 %v2039_v54  ;;  %v1301_v30 = vpop.f32.mrf.mxu1  ;;  %v1213_v32 = vadd.f32 %v1212_v57, %v3390_v10  ;;  %v1766_v25 = vmul.f32 %v3925_v13, %v1765_v45  ;;  %v1772_v10 = vand.u32 2147483647, %v3908_v31 }
 0x230   :  { %v1131_v57 = vadd.f32 %v3437_v0, %v3439_v5 }
 0x231   :  { %v2640_v3 = vpop.eup %2639  ;;  %v2471_v46 = vmul.f32 -1.442695, %v1388_v60  ;;  %v1302_v34 = vadd.f32 %v1301_v30, %v1213_v32  ;;  %v1767_v7 = vadd.f32 %v3925_v13, %v1766_v25  ;;  %vm1773_vm15 = vcmp.eq.f32.partialorder %v1772_v10, 8.507059e+37 }
 0x232   :  { %v2642_v17 = vpop.eup %2641  ;;  %v3931_v14 = vadd.f32 1.0, %v2640_v3 }
 0x233   :  { %v1779_v22 = vmul.f32 %v2642_v17, %v1536_v8  ;;  %2643 = vpow2.f32 %v2471_v46  ;;  %vm1784_vm0 = vweird.f32 %v2642_v17  ;;  %v1771_v40 = vsel %vm3941_vm13, %v3925_v13, %v1767_v7 }
 0x234   :  { %2645 = vrcp.f32 %v3931_v14  ;;  %vm1785_vm1 = vmor %vm1783_vm14, %vm1784_vm0  ;;  %v1776_v23 = vsel %vm1773_vm15, %v1775_v56, %v1771_v40  ;;  %vm1798_vm4 = vweird.f32 %v3931_v14  ;;  %v1802_v32 = vand.u32 2147483647, %v3931_v14 }
 0x235   :  { %v1780_v53 = vsub.f32 1.0, %v1779_v22  ;;  %v1804_v25 = vand.u32 2147483648, %v3931_v14 }
 0x236   :  { %v1390_v20 = vpop.f32.mrf.mxu2  ;;  %v1214_v51 = vpop.f32.mrf.mxu0  ;;  %vm1803_vm8 = vcmp.eq.f32.partialorder %v1802_v32, 8.507059e+37 }
 0x237   :  { %v1391_v47 = vadd.f32 %v1390_v20, %v1302_v34  ;;  %v1303_v6 = vpop.f32.mrf.mxu1  ;;  %v1781_v26 = vmul.f32 %v2642_v17, %v1780_v53  ;;  %v1215_v62 = vadd.f32 %v1214_v51, %v1126_v4 }
 0x239   :  { %v2644_v44 = vpop.eup %2643  ;;  %v2472_v21 = vmul.f32 -1.442695, %v1391_v47  ;;  %v1782_v31 = vadd.f32 %v2642_v17, %v1781_v26  ;;  %v1304_v33 = vadd.f32 %v1303_v6, %v1215_v62  ;;  %v3980_v47 = vpop.f32.mrf.mxu3  ;;  %v1805_v6 = vor.u32 1.1754944e-38, %v1804_v25 }
 0x23a   :  { %v3948_v42 = vpop.eup %2645  ;;  %v3950_v52 = vadd.f32 1.0, %v2644_v44 }
 0x23b   :  { %v1794_v41 = vmul.f32 %v3948_v42, %v3931_v14  ;;  %2647 = vpow2.f32 %v2472_v21  ;;  %v1786_v18 = vsel %vm1785_vm1, %v2642_v17, %v1782_v31  ;;  %vm1799_vm3 = vweird.f32 %v3948_v42 }
 0x23c   :  { %2649 = vrcp.f32 %v3950_v52  ;;  %v1791_v48 = vsel %vm1788_vm2, %v1790_v1, %v1786_v18  ;;  %v1819_v17 = vand.u32 2147483648, %v3950_v52  ;;  %v1817_v34 = vand.u32 2147483647, %v3950_v52  ;;  %vm3970_vm6 = vmor %vm1798_vm4, %vm1799_vm3 }
 0x23d   :  { %v2040_v13 = vpack.c.bf16 %v1791_v48, %v1776_v23  ;;  %v1795_v8 = vsub.f32 1.0, %v1794_v41  ;;  %vm1813_vm7 = vweird.f32 %v3950_v52  ;;  %v3990_v41 = vld [vmem:[%s4314_s4] ss:$0 sm:$0xff] }
 0x23e   :  { %v1392_v59 = vpop.f32.mrf.mxu2  ;;  %v1217_v11 = vpop.f32.mrf.mxu0  ;;  %v1820_v26 = vor.u32 1.1754944e-38, %v1819_v17  ;;  %vm1818_vm10 = vcmp.eq.f32.partialorder %v1817_v34, 8.507059e+37 }
 0x23f   :  { %v1393_v38 = vadd.f32 %v1392_v59, %v1304_v33  ;;  %2160 = vmatmul.bf16.gmra.mxu3 %v2040_v13  ;;  %v1306_v15 = vpop.f32.mrf.mxu1  ;;  %v1218_v2 = vadd.f32 %v1217_v11, %v3417_v49  ;;  %v1796_v54 = vmul.f32 %v3948_v42, %v1795_v8 }
 0x241   :  { %v2648_v63 = vpop.eup %2647  ;;  %v2473_v12 = vmul.f32 -1.442695, %v1393_v38  ;;  %v1307_v30 = vadd.f32 %v1306_v15, %v1218_v2  ;;  %v1797_v3 = vadd.f32 %v3948_v42, %v1796_v54  ;;  %v1136_v2 = vadd.f32 %v3467_v43, %v3469_v50 }
 0x242   :  { %v2650_v45 = vpop.eup %2649  ;;  %v3957_v36 = vadd.f32 1.0, %v2648_v63 }
 0x243   :  { %v1809_v60 = vmul.f32 %v2650_v45, %v3950_v52  ;;  %2651 = vpow2.f32 %v2473_v12  ;;  %vm1814_vm5 = vweird.f32 %v2650_v45  ;;  %v1801_v14 = vsel %vm3970_vm6, %v3948_v42, %v1797_v3 }
 0x244   :  { %2653 = vrcp.f32 %v3957_v36  ;;  %vm1815_vm9 = vmor %vm1813_vm7, %vm1814_vm5  ;;  %v1806_v44 = vsel %vm1803_vm8, %v1805_v6, %v1801_v14  ;;  %v1832_v15 = vand.u32 2147483647, %v3957_v36  ;;  %vm1828_vm12 = vweird.f32 %v3957_v36 }
 0x245   :  { %v1810_v46 = vsub.f32 1.0, %v1809_v60 }
 0x246   :  { %v1395_v49 = vpop.f32.mrf.mxu2  ;;  %v1219_v4 = vpop.f32.mrf.mxu0  ;;  %vm4015_vm14 = vcmp.eq.f32.partialorder %v1832_v15, 8.507059e+37 }
 0x247   :  { %v1396_v22 = vadd.f32 %v1395_v49, %v1307_v30  ;;  %v1308_v0 = vpop.f32.mrf.mxu1  ;;  %v1811_v5 = vmul.f32 %v2650_v45, %v1810_v46  ;;  %v1220_v10 = vadd.f32 %v1219_v4, %v1131_v57 }
 0x249   :  { %v2652_v53 = vpop.eup %2651  ;;  %v2474_v20 = vmul.f32 -1.442695, %v1396_v22  ;;  %v1812_v37 = vadd.f32 %v2650_v45, %v1811_v5  ;;  %v1309_v62 = vadd.f32 %v1308_v0, %v1220_v10 }
 0x24a   :  { %v3978_v58 = vpop.eup %2653  ;;  %v3982_v51 = vadd.f32 1.0, %v2652_v53 }
 0x24b   :  { %v1824_v29 = vmul.f32 %v3978_v58, %v3957_v36  ;;  %2655 = vpow2.f32 %v2474_v20  ;;  %v1816_v39 = vsel %vm1815_vm9, %v2650_v45, %v1812_v37  ;;  %vm1829_vm11 = vweird.f32 %v3978_v58 }
 0x24c   :  { %2657 = vrcp.f32 %v3982_v51  ;;  %v1821_v21 = vsel %vm1818_vm10, %v1820_v26, %v1816_v39  ;;  %v1834_v45 = vand.u32 2147483648, %v3957_v36  ;;  %v1847_v60 = vand.u32 2147483647, %v3982_v51  ;;  %vm4011_vm13 = vmor %vm1828_vm12, %vm1829_vm11 }
 0x24d   :  { %v2041_v40 = vpack.c.bf16 %v1821_v21, %v1806_v44  ;;  %v1825_v31 = vsub.f32 1.0, %v1824_v29  ;;  %v1849_v57 = vand.u32 2147483648, %v3982_v51  ;;  %vm1843_vm15 = vweird.f32 %v3982_v51 }
 0x24e   :  { %v1397_v42 = vpop.f32.mrf.mxu2  ;;  %v1222_v56 = vpop.f32.mrf.mxu0  ;;  %v1835_v34 = vor.u32 1.1754944e-38, %v1834_v45  ;;  %vm1848_vm2 = vcmp.eq.f32.partialorder %v1847_v60, 8.507059e+37 }
 0x24f   :  { %v1398_v52 = vadd.f32 %v1397_v42, %v1309_v62  ;;  %2165 = vmatmul.bf16.gmra.mxu3 %v2041_v40  ;;  %v1311_v1 = vpop.f32.mrf.mxu1  ;;  %v1223_v48 = vadd.f32 %v1222_v56, %v3447_v28  ;;  %v1826_v33 = vmul.f32 %v3978_v58, %v1825_v31  ;;  %v1850_v7 = vor.u32 1.1754944e-38, %v1849_v57 }
 0x251   :  { %v2656_v18 = vpop.eup %2655  ;;  %v2475_v23 = vmul.f32 -1.442695, %v1398_v52  ;;  %v1312_v63 = vadd.f32 %v1311_v1, %v1223_v48  ;;  %v1827_v28 = vadd.f32 %v3978_v58, %v1826_v33 }
 0x252   :  { %v2658_v13 = vpop.eup %2657  ;;  %v3994_v8 = vadd.f32 1.0, %v2656_v18  ;;  %v2126_v59 = vpop.f32.mrf.mxu3 }
 0x253   :  { %v1839_v38 = vmul.f32 %v2658_v13, %v3982_v51  ;;  %2659 = vpow2.f32 %v2475_v23  ;;  %v2127_v11 = vadd.f32 %v3990_v41, %v2126_v59  ;;  %vm1844_vm0 = vweird.f32 %v2658_v13 }
 0x254   :  { %2661 = vrcp.f32 %v3994_v8  ;;  %v1831_v22 = vsel %vm4011_vm13, %v3978_v58, %v1827_v28  ;;  %vm1845_vm1 = vmor %vm1843_vm15, %vm1844_vm0  ;;  %v1862_v23 = vand.u32 2147483647, %v3994_v8  ;;  %vm1858_vm4 = vweird.f32 %v3994_v8 }
 0x255   :  { %2206 = vst [vmem:[%s4315_s5] sm:$0xff] %v2127_v11  ;;  %v1840_v12 = vsub.f32 1.0, %v1839_v38  ;;  %v1836_v14 = vsel %vm4015_vm14, %v1835_v34, %v1831_v22  ;;  %v1864_v38 = vand.u32 2147483648, %v3994_v8 }
 0x256   :  { %v1400_v54 = vpop.f32.mrf.mxu2  ;;  %v1224_v3 = vpop.f32.mrf.mxu0  ;;  %vm4059_vm7 = vcmp.eq.f32.partialorder %v1862_v23, 8.507059e+37 }
 0x257   :  { %v1401_v30 = vadd.f32 %v1400_v54, %v1312_v63  ;;  %v1313_v46 = vpop.f32.mrf.mxu1  ;;  %v1841_v49 = vmul.f32 %v2658_v13, %v1840_v12  ;;  %v1225_v17 = vadd.f32 %v1224_v3, %v1136_v2 }
 0x259   :  { %v2660_v50 = vpop.eup %2659  ;;  %v2476_v25 = vmul.f32 -1.442695, %v1401_v30  ;;  %v1842_v36 = vadd.f32 %v2658_v13, %v1841_v49  ;;  %v1314_v58 = vadd.f32 %v1313_v46, %v1225_v17  ;;  %v1865_v49 = vor.u32 1.1754944e-38, %v1864_v38 }
 0x25a   :  { %v4023_v4 = vpop.eup %2661  ;;  %v4025_v0 = vadd.f32 1.0, %v2660_v50  ;;  %v2128_v5 = vpop.f32.mrf.mxu3 }
 0x25b   :  { %v1854_v53 = vmul.f32 %v4023_v4, %v3994_v8  ;;  %2663 = vpow2.f32 %v2476_v25  ;;  %v2129_v20 = vadd.f32 %v3990_v41, %v2128_v5  ;;  %v1846_v10 = vsel %vm1845_vm1, %v2658_v13, %v1842_v36 }
 0x25c   :  { %2665 = vrcp.f32 %v4025_v0  ;;  %v1851_v37 = vsel %vm1848_vm2, %v1850_v7, %v1846_v10  ;;  %vm1859_vm3 = vweird.f32 %v4023_v4  ;;  %v1141_v13 = vadd.f32 %v3494_v27, %v3496_v35 }
 0x25d   :  { %2207 = vst [vmem:[%s4315_s5 + $0x8] sm:$0xff] %v2129_v20  ;;  %v2042_v51 = vpack.c.bf16 %v1851_v37, %v1836_v14  ;;  %v1855_v6 = vsub.f32 1.0, %v1854_v53  ;;  %v1877_v11 = vand.u32 2147483647, %v4025_v0  ;;  %v1879_v15 = vand.u32 2147483648, %v4025_v0  ;;  %vm4055_vm6 = vmor %vm1858_vm4, %vm1859_vm3 }
 0x25e   :  { %v1402_v26 = vpop.f32.mrf.mxu2  ;;  %v1227_v39 = vpop.f32.mrf.mxu0  ;;  %vm1873_vm8 = vweird.f32 %v4025_v0 }
 0x25f   :  { %v1403_v29 = vadd.f32 %v1402_v26, %v1314_v58  ;;  %2170 = vmatmul.bf16.gmra.mxu3 %v2042_v51  ;;  %v1316_v44 = vpop.f32.mrf.mxu1  ;;  %v1228_v40 = vadd.f32 %v1227_v39, %v3474_v9  ;;  %v1856_v31 = vmul.f32 %v4023_v4, %v1855_v6  ;;  %vm1878_vm10 = vcmp.eq.f32.partialorder %v1877_v11, 8.507059e+37 }
 0x260   :  { %v1880_v32 = vor.u32 1.1754944e-38, %v1879_v15 }
 0x261   :  { %v2664_v21 = vpop.eup %2663  ;;  %v2477_v62 = vmul.f32 -1.442695, %v1403_v29  ;;  %v1317_v48 = vadd.f32 %v1316_v44, %v1228_v40  ;;  %v1857_v9 = vadd.f32 %v4023_v4, %v1856_v31 }
 0x262   :  { %v2666_v42 = vpop.eup %2665  ;;  %v4038_v52 = vadd.f32 1.0, %v2664_v21  ;;  %v2131_v56 = vpop.f32.mrf.mxu3 }
 0x263   :  { %v1869_v1 = vmul.f32 %v2666_v42, %v4025_v0  ;;  %2667 = vpow2.f32 %v2477_v62  ;;  %v2132_v18 = vadd.f32 %v3990_v41, %v2131_v56  ;;  %vm1874_vm5 = vweird.f32 %v2666_v42 }
 0x264   :  { %2669 = vrcp.f32 %v4038_v52  ;;  %v1861_v57 = vsel %vm4055_vm6, %v4023_v4, %v1857_v9  ;;  %vm1875_vm9 = vmor %vm1873_vm8, %vm1874_vm5  ;;  %v1892_v39 = vand.u32 2147483647, %v4038_v52  ;;  %v1146_v62 = vadd.f32 %v3524_v16, %v3526_v24 }
 0x265   :  { %2208 = vst [vmem:[%s4315_s5 + $0x10] sm:$0xff] %v2132_v18  ;;  %v1870_v33 = vsub.f32 1.0, %v1869_v1  ;;  %v1866_v17 = vsel %vm4059_vm7, %v1865_v49, %v1861_v57  ;;  %v1894_v31 = vand.u32 2147483648, %v4038_v52  ;;  %vm1888_vm12 = vweird.f32 %v4038_v52 }
 0x266   :  { %v1405_v59 = vpop.f32.mrf.mxu2  ;;  %v1229_v28 = vpop.f32.mrf.mxu0  ;;  %vm4103_vm14 = vcmp.eq.f32.partialorder %v1892_v39, 8.507059e+37 }
 0x267   :  { %v1406_v63 = vadd.f32 %v1405_v59, %v1317_v48  ;;  %v1318_v12 = vpop.f32.mrf.mxu1  ;;  %v1871_v2 = vmul.f32 %v2666_v42, %v1870_v33  ;;  %v1230_v60 = vadd.f32 %v1229_v28, %v1141_v13 }
 0x269   :  { %v2668_v35 = vpop.eup %2667  ;;  %v2478_v45 = vmul.f32 -1.442695, %v1406_v63  ;;  %v1872_v8 = vadd.f32 %v2666_v42, %v1871_v2  ;;  %v1319_v36 = vadd.f32 %v1318_v12, %v1230_v60  ;;  %v1895_v63 = vor.u32 1.1754944e-38, %v1894_v31 }
 0x26a   :  { %v4067_v30 = vpop.eup %2669  ;;  %v4069_v3 = vadd.f32 1.0, %v2668_v35  ;;  %v2133_v46 = vpop.f32.mrf.mxu3 }
 0x26b   :  { %v1884_v43 = vmul.f32 %v4067_v30, %v4038_v52  ;;  %2671 = vpow2.f32 %v2478_v45  ;;  %v2134_v50 = vadd.f32 %v3990_v41, %v2133_v46  ;;  %v1876_v25 = vsel %vm1875_vm9, %v2666_v42, %v1872_v8 }
 0x26c   :  { %2673 = vrcp.f32 %v4069_v3  ;;  %v1881_v22 = vsel %vm1878_vm10, %v1880_v32, %v1876_v25  ;;  %vm1889_vm11 = vweird.f32 %v4067_v30  ;;  %v1907_v42 = vand.u32 2147483647, %v4069_v3 }
 0x26d   :  { %2209 = vst [vmem:[%s4315_s5 + $0x18] sm:$0xff] %v2134_v50  ;;  %v2043_v4 = vpack.c.bf16 %v1881_v22, %v1866_v17  ;;  %v1885_v0 = vsub.f32 1.0, %v1884_v43  ;;  %v1909_v56 = vand.u32 2147483648, %v4069_v3  ;;  %vm4099_vm13 = vmor %vm1888_vm12, %vm1889_vm11  ;;  %vm1903_vm15 = vweird.f32 %v4069_v3 }
 0x26e   :  { %v1407_v5 = vpop.f32.mrf.mxu2  ;;  %v1232_v7 = vpop.f32.mrf.mxu0  ;;  %vm1908_vm2 = vcmp.eq.f32.partialorder %v1907_v42, 8.507059e+37 }
 0x26f   :  { %v1408_v34 = vadd.f32 %v1407_v5, %v1319_v36  ;;  %2175 = vmatmul.bf16.gmra.mxu3 %v2043_v4  ;;  %v1321_v53 = vpop.f32.mrf.mxu1  ;;  %v1233_v14 = vadd.f32 %v1232_v7, %v3504_v61  ;;  %v1886_v37 = vmul.f32 %v4067_v30, %v1885_v0  ;;  %v1910_v28 = vor.u32 1.1754944e-38, %v1909_v56  ;;  %v4349_v7 = vld [vmem:[#allocation2_spill] sm:$0xff] }
 0x271   :  { %v2672_v20 = vpop.eup %2671  ;;  %v2479_v10 = vmul.f32 -1.442695, %v1408_v34  ;;  %v1322_v44 = vadd.f32 %v1321_v53, %v1233_v14  ;;  %v1887_v61 = vadd.f32 %v4067_v30, %v1886_v37  ;;  %v1151_v53 = vadd.f32 %v4349_v7, %v3553_v19 }
 0x272   :  { %v2674_v58 = vpop.eup %2673  ;;  %v4082_v51 = vadd.f32 1.0, %v2672_v20  ;;  %v2136_v6 = vpop.f32.mrf.mxu3 }
 0x273   :  { %v1899_v26 = vmul.f32 %v2674_v58, %v4069_v3  ;;  %2675 = vpow2.f32 %v2479_v10  ;;  %v2137_v29 = vadd.f32 %v3990_v41, %v2136_v6  ;;  %vm1904_vm0 = vweird.f32 %v2674_v58 }
 0x274   :  { %2677 = vrcp.f32 %v4082_v51  ;;  %v1891_v59 = vsel %vm4099_vm13, %v4067_v30, %v1887_v61  ;;  %vm1905_vm1 = vmor %vm1903_vm15, %vm1904_vm0  ;;  %v1922_v0 = vand.u32 2147483647, %v4082_v51  ;;  %v1924_v10 = vand.u32 2147483648, %v4082_v51 }
 0x275   :  { %2210 = vst [vmem:[%s4315_s5 + $0x20] sm:$0xff] %v2137_v29  ;;  %v1900_v21 = vsub.f32 1.0, %v1899_v26  ;;  %v1896_v27 = vsel %vm4103_vm14, %v1895_v63, %v1891_v59  ;;  %vm1918_vm4 = vweird.f32 %v4082_v51  ;;  %v4354_v63 = vld [vmem:[#allocation3_spill] sm:$0xff] }
 0x276   :  { %v1410_v40 = vpop.f32.mrf.mxu2  ;;  %v1234_v18 = vpop.f32.mrf.mxu0  ;;  %vm4147_vm7 = vcmp.eq.f32.partialorder %v1922_v0, 8.507059e+37  ;;  %v1925_v56 = vor.u32 1.1754944e-38, %v1924_v10 }
 0x277   :  { %v1411_v1 = vadd.f32 %v1410_v40, %v1322_v44  ;;  %v1323_v23 = vpop.f32.mrf.mxu1  ;;  %v1901_v48 = vmul.f32 %v2674_v58, %v1900_v21  ;;  %v1235_v13 = vadd.f32 %v1234_v18, %v1146_v62 }
 0x279   :  { %v2676_v24 = vpop.eup %2675  ;;  %v2480_v33 = vmul.f32 -1.442695, %v1411_v1  ;;  %v1902_v52 = vadd.f32 %v2674_v58, %v1901_v48  ;;  %v1324_v45 = vadd.f32 %v1323_v23, %v1235_v13 }
 0x27a   :  { %v4111_v38 = vpop.eup %2677  ;;  %v4113_v11 = vadd.f32 1.0, %v2676_v24  ;;  %v2138_v15 = vpop.f32.mrf.mxu3 }
 0x27b   :  { %v1914_v12 = vmul.f32 %v4111_v38, %v4082_v51  ;;  %2679 = vpow2.f32 %v2480_v33  ;;  %v2139_v2 = vadd.f32 %v3990_v41, %v2138_v15  ;;  %v1906_v54 = vsel %vm1905_vm1, %v2674_v58, %v1902_v52 }
 0x27c   :  { %2681 = vrcp.f32 %v4113_v11  ;;  %v1911_v35 = vsel %vm1908_vm2, %v1910_v28, %v1906_v54  ;;  %vm1919_vm3 = vweird.f32 %v4111_v38  ;;  %v1937_v14 = vand.u32 2147483647, %v4113_v11 }
 0x27d   :  { %2211 = vst [vmem:[%s4315_s5 + $0x28] sm:$0xff] %v2139_v2  ;;  %v2044_v60 = vpack.c.bf16 %v1911_v35, %v1896_v27  ;;  %v1915_v57 = vsub.f32 1.0, %v1914_v12  ;;  %v1939_v37 = vand.u32 2147483648, %v4113_v11  ;;  %vm4143_vm6 = vmor %vm1918_vm4, %vm1919_vm3  ;;  %vm1933_vm8 = vweird.f32 %v4113_v11 }
 0x27e   :  { %v1412_v8 = vpop.f32.mrf.mxu2  ;;  %v1237_v3 = vpop.f32.mrf.mxu0  ;;  %vm1938_vm10 = vcmp.eq.f32.partialorder %v1937_v14, 8.507059e+37 }
 0x27f   :  { %v1413_v30 = vadd.f32 %v1412_v8, %v1324_v45  ;;  %2180 = vmatmul.bf16.gmra.mxu3 %v2044_v60  ;;  %v1326_v46 = vpop.f32.mrf.mxu1  ;;  %v1238_v43 = vadd.f32 %v1237_v3, %v3531_v55  ;;  %v1916_v50 = vmul.f32 %v4111_v38, %v1915_v57  ;;  %v1940_v1 = vor.u32 1.1754944e-38, %v1939_v37 }
 0x281   :  { %v2680_v49 = vpop.eup %2679  ;;  %v2481_v32 = vmul.f32 -1.442695, %v1413_v30  ;;  %v1327_v5 = vadd.f32 %v1326_v46, %v1238_v43  ;;  %v1917_v55 = vadd.f32 %v4111_v38, %v1916_v50  ;;  %v4355_v46 = vld [vmem:[#allocation4_spill] sm:$0xff] }
 0x282   :  { %v2682_v25 = vpop.eup %2681  ;;  %v4126_v17 = vadd.f32 1.0, %v2680_v49  ;;  %v2141_v22 = vpop.f32.mrf.mxu3  ;;  %v1156_v49 = vadd.f32 %v3980_v47, %v4355_v46 }
 0x283   :  { %v1929_v36 = vmul.f32 %v2682_v25, %v4113_v11  ;;  %2683 = vpow2.f32 %v2481_v32  ;;  %v2142_v4 = vadd.f32 %v3990_v41, %v2141_v22  ;;  %vm1934_vm5 = vweird.f32 %v2682_v25 }
 0x284   :  { %2685 = vrcp.f32 %v4126_v17  ;;  %v1921_v51 = vsel %vm4143_vm6, %v4111_v38, %v1917_v55  ;;  %vm1935_vm9 = vmor %vm1933_vm8, %vm1934_vm5  ;;  %v1952_v57 = vand.u32 2147483647, %v4126_v17  ;;  %v1954_v43 = vand.u32 2147483648, %v4126_v17 }
 0x285   :  { %2212 = vst [vmem:[%s4315_s5 + $0x30] sm:$0xff] %v2142_v4  ;;  %v1930_v34 = vsub.f32 1.0, %v1929_v36  ;;  %v1926_v9 = vsel %vm4147_vm7, %v1925_v56, %v1921_v51  ;;  %vm1948_vm12 = vweird.f32 %v4126_v17 }
 0x286   :  { %v1415_v20 = vpop.f32.mrf.mxu2  ;;  %v1239_v6 = vpop.f32.mrf.mxu0  ;;  %vm4191_vm14 = vcmp.eq.f32.partialorder %v1952_v57, 8.507059e+37  ;;  %v1955_v14 = vor.u32 1.1754944e-38, %v1954_v43 }
 0x287   :  { %v1416_v58 = vadd.f32 %v1415_v20, %v1327_v5  ;;  %v1931_v26 = vmul.f32 %v2682_v25, %v1930_v34  ;;  %v1328_v29 = vpop.f32.mrf.mxu1  ;;  %v1240_v21 = vadd.f32 %v1239_v6, %v1151_v53 }
 0x289   :  { %v2684_v44 = vpop.eup %2683  ;;  %v2482_v61 = vmul.f32 -1.442695, %v1416_v58  ;;  %v1932_v62 = vadd.f32 %v2682_v25, %v1931_v26  ;;  %v1329_v24 = vadd.f32 %v1328_v29, %v1240_v21 }
 0x28a   :  { %v4155_v40 = vpop.eup %2685  ;;  %v4157_v31 = vadd.f32 1.0, %v2684_v44  ;;  %v2143_v42 = vpop.f32.mrf.mxu3 }
 0x28b   :  { %v1944_v18 = vmul.f32 %v4155_v40, %v4126_v17  ;;  %2687 = vpow2.f32 %v2482_v61  ;;  %v2144_v23 = vadd.f32 %v3990_v41, %v2143_v42  ;;  %v1936_v48 = vsel %vm1935_vm9, %v2682_v25, %v1932_v62 }
 0x28c   :  { %2689 = vrcp.f32 %v4157_v31  ;;  %v1941_v16 = vsel %vm1938_vm10, %v1940_v1, %v1936_v48  ;;  %vm1949_vm11 = vweird.f32 %v4155_v40  ;;  %v1967_v50 = vand.u32 2147483647, %v4157_v31 }
 0x28d   :  { %2213 = vst [vmem:[%s4315_s5 + $0x38] sm:$0xff] %v2144_v23  ;;  %v2045_v33 = vpack.c.bf16 %v1941_v16, %v1926_v9  ;;  %v1945_v13 = vsub.f32 1.0, %v1944_v18  ;;  %v1969_v25 = vand.u32 2147483648, %v4157_v31  ;;  %vm4187_vm13 = vmor %vm1948_vm12, %vm1949_vm11  ;;  %vm1963_vm15 = vweird.f32 %v4157_v31 }
 0x28e   :  { %v1417_v59 = vpop.f32.mrf.mxu2  ;;  %v1242_v38 = vpop.f32.mrf.mxu0  ;;  %vm1968_vm2 = vcmp.eq.f32.partialorder %v1967_v50, 8.507059e+37 }
 0x28f   :  { %v1418_v52 = vadd.f32 %v1417_v59, %v1329_v24  ;;  %2185 = vmatmul.bf16.gmra.mxu3 %v2045_v33  ;;  %v1243_v28 = vadd.f32 %v1242_v38, %v4354_v63  ;;  %v1946_v12 = vmul.f32 %v4155_v40, %v1945_v13  ;;  %v1331_v27 = vpop.f32.mrf.mxu1  ;;  %v1970_v37 = vor.u32 1.1754944e-38, %v1969_v25 }
 0x291   :  { %v2688_v11 = vpop.eup %2687  ;;  %v2483_v15 = vmul.f32 -1.442695, %v1418_v52  ;;  %v1332_v8 = vadd.f32 %v1331_v27, %v1243_v28  ;;  %v1947_v30 = vadd.f32 %v4155_v40, %v1946_v12 }
 0x292   :  { %v2690_v2 = vpop.eup %2689  ;;  %v4170_v54 = vadd.f32 1.0, %v2688_v11  ;;  %v2146_v35 = vpop.f32.mrf.mxu3 }
 0x293   :  { %v1959_v45 = vmul.f32 %v2690_v2, %v4157_v31  ;;  %2691 = vpow2.f32 %v2483_v15  ;;  %v2147_v60 = vadd.f32 %v3990_v41, %v2146_v35  ;;  %vm1964_vm0 = vweird.f32 %v2690_v2 }
 0x294   :  { %2693 = vrcp.f32 %v4170_v54  ;;  %v1951_v7 = vsel %vm4187_vm13, %v4155_v40, %v1947_v30  ;;  %vm1965_vm1 = vmor %vm1963_vm15, %vm1964_vm0  ;;  %v1982_v24 = vand.u32 2147483647, %v4170_v54  ;;  %v1984_v33 = vand.u32 2147483648, %v4170_v54 }
 0x295   :  { %2214 = vst [vmem:[%s4315_s5 + $0x40] sm:$0xff] %v2147_v60  ;;  %v1960_v3 = vsub.f32 1.0, %v1959_v45  ;;  %v1956_v39 = vsel %vm4191_vm14, %v1955_v14, %v1951_v7  ;;  %vm1978_vm4 = vweird.f32 %v4170_v54 }
 0x296   :  { %v1420_v32 = vpop.f32.mrf.mxu2  ;;  %v1244_v36 = vpop.f32.mrf.mxu0  ;;  %vm1983_vm8 = vcmp.eq.f32.partialorder %v1982_v24, 8.507059e+37  ;;  %v1985_v27 = vor.u32 1.1754944e-38, %v1984_v33 }
 0x297   :  { %v1421_v22 = vadd.f32 %v1420_v32, %v1332_v8  ;;  %v1961_v4 = vmul.f32 %v2690_v2, %v1960_v3  ;;  %v1245_v34 = vadd.f32 %v1244_v36, %v1156_v49  ;;  %v1333_v29 = vpop.f32.mrf.mxu1 }
 0x299   :  { %v2692_v47 = vpop.eup %2691  ;;  %v2484_v55 = vmul.f32 -1.442695, %v1421_v22  ;;  %v1962_v17 = vadd.f32 %v2690_v2, %v1961_v4  ;;  %v1334_v44 = vadd.f32 %v1333_v29, %v1245_v34 }
 0x29a   :  { %v2694_v53 = vpop.eup %2693  ;;  %v1550_v20 = vadd.f32 1.0, %v2692_v47  ;;  %v2148_v10 = vpop.f32.mrf.mxu3 }
 0x29b   :  { %v1974_v58 = vmul.f32 %v2694_v53, %v4170_v54  ;;  %2695 = vpow2.f32 %v2484_v55  ;;  %v2149_v6 = vadd.f32 %v3990_v41, %v2148_v10  ;;  %v1966_v26 = vsel %vm1965_vm1, %v2690_v2, %v1962_v17 }
 0x29c   :  { %2697 = vrcp.f32 %v1550_v20  ;;  %v1971_v19 = vsel %vm1968_vm2, %v1970_v37, %v1966_v26  ;;  %vm1979_vm3 = vweird.f32 %v2694_v53  ;;  %v1999_v13 = vand.u32 2147483648, %v1550_v20 }
 0x29d   :  { %2215 = vst [vmem:[%s4315_s5 + $0x48] sm:$0xff] %v2149_v6  ;;  %v2046_v61 = vpack.c.bf16 %v1971_v19, %v1956_v39  ;;  %v1975_v21 = vsub.f32 1.0, %v1974_v58  ;;  %v1997_v52 = vand.u32 2147483647, %v1550_v20  ;;  %vm4216_vm6 = vmor %vm1978_vm4, %vm1979_vm3  ;;  %vm1993_vm7 = vweird.f32 %v1550_v20 }
 0x29e   :  { %v1422_v51 = vpop.f32.mrf.mxu2  ;;  %v2000_v54 = vor.u32 1.1754944e-38, %v1999_v13 }
 0x29f   :  { %v1423_v62 = vadd.f32 %v1422_v51, %v1334_v44  ;;  %2190 = vmatmul.bf16.gmra.mxu3 %v2046_v61  ;;  %v1976_v42 = vmul.f32 %v2694_v53, %v1975_v21  ;;  %vm1998_vm10 = vcmp.eq.f32.partialorder %v1997_v52, 8.507059e+37 }
 0x2a1   :  { %v2696_v40 = vpop.eup %2695  ;;  %v2485_v31 = vmul.f32 -1.442695, %v1423_v62  ;;  %v1977_v9 = vadd.f32 %v2694_v53, %v1976_v42 }
 0x2a2   :  { %v2698_v56 = vpop.eup %2697  ;;  %v4206_v1 = vadd.f32 1.0, %v2696_v40  ;;  %v2151_v18 = vpop.f32.mrf.mxu3 }
 0x2a3   :  { %v1989_v23 = vmul.f32 %v2698_v56, %v1550_v20  ;;  %2699 = vpow2.f32 %v2485_v31  ;;  %v2152_v48 = vadd.f32 %v3990_v41, %v2151_v18  ;;  %vm1994_vm5 = vweird.f32 %v2698_v56 }
 0x2a4   :  { %2701 = vrcp.f32 %v4206_v1  ;;  %v1981_v15 = vsel %vm4216_vm6, %v2694_v53, %v1977_v9  ;;  %vm1995_vm9 = vmor %vm1993_vm7, %vm1994_vm5  ;;  %vm2008_vm12 = vweird.f32 %v4206_v1  ;;  %v2014_v36 = vand.u32 2147483648, %v4206_v1 }
 0x2a5   :  { %2216 = vst [vmem:[%s4315_s5 + $0x50] sm:$0xff] %v2152_v48  ;;  %v1990_v16 = vsub.f32 1.0, %v1989_v23  ;;  %v1986_v57 = vsel %vm1983_vm8, %v1985_v27, %v1981_v15  ;;  %v2012_v0 = vand.u32 2147483647, %v4206_v1 }
 0x2a6   :  { %v2015_v17 = vor.u32 1.1754944e-38, %v2014_v36 }
 0x2a7   :  { %v1991_v59 = vmul.f32 %v2698_v56, %v1990_v16  ;;  %vm2013_vm1 = vcmp.eq.f32.partialorder %v2012_v0, 8.507059e+37 }
 0x2a9   :  { %v2700_v11 = vpop.eup %2699  ;;  %v1992_v63 = vadd.f32 %v2698_v56, %v1991_v59 }
 0x2aa   :  { %v2702_v28 = vpop.eup %2701  ;;  %v1552_v12 = vadd.f32 1.0, %v2700_v11  ;;  %v2153_v2 = vpop.f32.mrf.mxu3 }
 0x2ab   :  { %v2004_v35 = vmul.f32 %v2702_v28, %v4206_v1  ;;  %v2154_v45 = vadd.f32 %v3990_v41, %v2153_v2  ;;  %v1996_v60 = vsel %vm1995_vm9, %v2698_v56, %v1992_v63  ;;  %vm2009_vm11 = vweird.f32 %v2702_v28 }
 0x2ac   :  { %2703 = vrcp.f32 %v1552_v12  ;;  %v2001_v8 = vsel %vm1998_vm10, %v2000_v54, %v1996_v60  ;;  %v2029_v4 = vand.u32 2147483648, %v1552_v12  ;;  %v2027_v47 = vand.u32 2147483647, %v1552_v12  ;;  %vm2010_vm13 = vmor %vm2008_vm12, %vm2009_vm11 }
 0x2ad   :  { %2217 = vst [vmem:[%s4315_s5 + $0x58] sm:$0xff] %v2154_v45  ;;  %v2047_v30 = vpack.c.bf16 %v2001_v8, %v1986_v57  ;;  %v2005_v3 = vsub.f32 1.0, %v2004_v35  ;;  %vm2023_vm14 = vweird.f32 %v1552_v12 }
 0x2ae   :  { %v2030_v53 = vor.u32 1.1754944e-38, %v2029_v4  ;;  %vm2028_vm2 = vcmp.eq.f32.partialorder %v2027_v47, 8.507059e+37 }
 0x2af   :  { %2195 = vmatmul.bf16.gmra.mxu3 %v2047_v30  ;;  %v2006_v46 = vmul.f32 %v2702_v28, %v2005_v3 }
 0x2b1   :  { %v2007_v25 = vadd.f32 %v2702_v28, %v2006_v46 }
 0x2b2   :  { %v2704_v49 = vpop.eup %2703  ;;  %v2156_v32 = vpop.f32.mrf.mxu3 }
 0x2b3   :  { %v2019_v43 = vmul.f32 %v2704_v49, %v1552_v12  ;;  %v2157_v50 = vadd.f32 %v3990_v41, %v2156_v32  ;;  %vm2024_vm0 = vweird.f32 %v2704_v49  ;;  %v2011_v55 = vsel %vm2010_vm13, %v2702_v28, %v2007_v25 }
 0x2b4   :  { %vm2025_vm15 = vmor %vm2023_vm14, %vm2024_vm0  ;;  %v2016_v14 = vsel %vm2013_vm1, %v2015_v17, %v2011_v55 }
 0x2b5   :  { %2218 = vst [vmem:[%s4315_s5 + $0x60] sm:$0xff] %v2157_v50  ;;  %v2020_v22 = vsub.f32 1.0, %v2019_v43 }
 0x2b7   :  { %v2021_v5 = vmul.f32 %v2704_v49, %v2020_v22 }
 0x2b9   :  { %v2022_v34 = vadd.f32 %v2704_v49, %v2021_v5 }
 0x2ba   :  { %v2158_v7 = vpop.f32.mrf.mxu3 }
 0x2bb   :  { %v2159_v20 = vadd.f32 %v3990_v41, %v2158_v7  ;;  %v2026_v10 = vsel %vm2025_vm15, %v2704_v49, %v2022_v34 }
 0x2bc   :  { %v2031_v37 = vsel %vm2028_vm2, %v2030_v53, %v2026_v10 }
 0x2bd   :  { %2219 = vst [vmem:[%s4315_s5 + $0x68] sm:$0xff] %v2159_v20  ;;  %v2048_v58 = vpack.c.bf16 %v2031_v37, %v2016_v14 }
 0x2bf   :  { %2200 = vmatmul.bf16.gmra.mxu3 %v2048_v58 }
 0x2c2   :  { %v2161_v6 = vpop.f32.mrf.mxu3 }
 0x2c3   :  { %v2162_v26 = vadd.f32 %v3990_v41, %v2161_v6 }
 0x2c5   :  { %2220 = vst [vmem:[%s4315_s5 + $0x70] sm:$0xff] %v2162_v26 }
 0x2ca   :  { %v2163_v29 = vpop.f32.mrf.mxu3 }
 0x2cb   :  { %v2164_v39 = vadd.f32 %v3990_v41, %v2163_v29 }
 0x2cd   :  { %2221 = vst [vmem:[%s4315_s5 + $0x78] sm:$0xff] %v2164_v39 }
 0x2d2   :  { %v2166_v19 = vpop.f32.mrf.mxu3 }
 0x2d3   :  { %v2167_v44 = vadd.f32 %v3990_v41, %v2166_v19 }
 0x2d5   :  { %2222 = vst [vmem:[%s4315_s5 + $0x80] sm:$0xff] %v2167_v44 }
 0x2da   :  { %v2168_v61 = vpop.f32.mrf.mxu3 }
 0x2db   :  { %v2169_v21 = vadd.f32 %v3990_v41, %v2168_v61 }
 0x2dd   :  { %2223 = vst [vmem:[%s4315_s5 + $0x88] sm:$0xff] %v2169_v21 }
 0x2e2   :  { %v2171_v51 = vpop.f32.mrf.mxu3 }
 0x2e3   :  { %v2172_v62 = vadd.f32 %v3990_v41, %v2171_v51 }
 0x2e5   :  { %2224 = vst [vmem:[%s4315_s5 + $0x90] sm:$0xff] %v2172_v62 }
 0x2ea   :  { %v2173_v40 = vpop.f32.mrf.mxu3 }
 0x2eb   :  { %v2174_v31 = vadd.f32 %v3990_v41, %v2173_v40 }
 0x2ed   :  { %2225 = vst [vmem:[%s4315_s5 + $0x98] sm:$0xff] %v2174_v31 }
 0x2f2   :  { %v2176_v42 = vpop.f32.mrf.mxu3 }
 0x2f3   :  { %v2177_v56 = vadd.f32 %v3990_v41, %v2176_v42 }
 0x2f5   :  { %2226 = vst [vmem:[%s4315_s5 + $0xa0] sm:$0xff] %v2177_v56 }
 0x2fa   :  { %v2178_v1 = vpop.f32.mrf.mxu3 }
 0x2fb   :  { %v2179_v18 = vadd.f32 %v3990_v41, %v2178_v1 }
 0x2fd   :  { %2227 = vst [vmem:[%s4315_s5 + $0xa8] sm:$0xff] %v2179_v18 }
 0x302   :  { %v2181_v23 = vpop.f32.mrf.mxu3 }
 0x303   :  { %v2182_v48 = vadd.f32 %v3990_v41, %v2181_v23 }
 0x305   :  { %2228 = vst [vmem:[%s4315_s5 + $0xb0] sm:$0xff] %v2182_v48 }
 0x30a   :  { %v2183_v9 = vpop.f32.mrf.mxu3 }
 0x30b   :  { %v2184_v16 = vadd.f32 %v3990_v41, %v2183_v9 }
 0x30d   :  { %2229 = vst [vmem:[%s4315_s5 + $0xb8] sm:$0xff] %v2184_v16 }
 0x312   :  { %v2186_v24 = vpop.f32.mrf.mxu3 }
 0x313   :  { %v2187_v33 = vadd.f32 %v3990_v41, %v2186_v24 }
 0x315   :  { %2230 = vst [vmem:[%s4315_s5 + $0xc0] sm:$0xff] %v2187_v33 }
 0x31a   :  { %v2188_v13 = vpop.f32.mrf.mxu3 }
 0x31b   :  { %v2189_v59 = vadd.f32 %v3990_v41, %v2188_v13 }
 0x31d   :  { %2231 = vst [vmem:[%s4315_s5 + $0xc8] sm:$0xff] %v2189_v59 }
 0x322   :  { %v2191_v52 = vpop.f32.mrf.mxu3 }
 0x323   :  { %v2192_v38 = vadd.f32 %v3990_v41, %v2191_v52 }
 0x325   :  { %2232 = vst [vmem:[%s4315_s5 + $0xd0] sm:$0xff] %v2192_v38 }
 0x32a   :  { %v2193_v11 = vpop.f32.mrf.mxu3 }
 0x32b   :  { %v2194_v15 = vadd.f32 %v3990_v41, %v2193_v11 }
 0x32d   :  { %2233 = vst [vmem:[%s4315_s5 + $0xd8] sm:$0xff] %v2194_v15 }
 0x332   :  { %v2196_v63 = vpop.f32.mrf.mxu3 }
 0x333   :  { %v2197_v28 = vadd.f32 %v3990_v41, %v2196_v63 }
 0x335   :  { %2234 = vst [vmem:[%s4315_s5 + $0xe0] sm:$0xff] %v2197_v28 }
 0x33a   :  { %v2198_v12 = vpop.f32.mrf.mxu3 }
 0x33b   :  { %v2199_v2 = vadd.f32 %v3990_v41, %v2198_v12 }
 0x33d   :  { %2235 = vst [vmem:[%s4315_s5 + $0xe8] sm:$0xff] %v2199_v2 }
 0x342   :  { %v2201_v27 = vpop.f32.mrf.mxu3 }
 0x343   :  { %v2202_v54 = vadd.f32 %v3990_v41, %v2201_v27 }
 0x345   :  { %2236 = vst [vmem:[%s4315_s5 + $0xf0] sm:$0xff] %v2202_v54 }
 0x34a   :  { %v2203_v35 = vpop.f32.mrf.mxu3 }
 0x34b   :  { %v2204_v45 = vadd.f32 %v3990_v41, %v2203_v35 }
 0x34d   :  { %2237 = vst [vmem:[%s4315_s5 + $0xf8] sm:$0xff] %v2204_v45 }

</bundles_post_ra>
